<compile_context>
chip_gen: v7x
topology: tpu7x:2x2x1
jax: 0.10.0
libtpu: 0.0.40
codegen_flags: <defaults>
</compile_context>

<pallas_src>
import functools

import jax
import jax.numpy as jnp
from jax.experimental import pallas as pl
from jax.experimental.pallas import tpu as pltpu


# ----------------------------------------------------------------------------
# Fused kernel: block-diag per-point MLPs + linear + GRU
# ----------------------------------------------------------------------------
def _encoder_kernel(x_ref, w1_ref, b1_ref, w2_ref, b2_ref, wl_ref, bl_ref,
                    wih_ref, bih_ref, whh_ref, bhh_ref,
                    out_ref, hid_ref, xg_scr):
    # Shapes (N = B*S, batch-major rows: row = b*S + s):
    #   x_ref  [N, P*D]    w1_ref [P*D, P*16] (block-diag)  b1_ref [1, P*16]
    #   w2_ref [P*16, P*8] (block-diag)                     b2_ref [1, P*8]
    #   wl_ref [P*8, H]    bl_ref [1, H]
    #   wih_ref/whh_ref [H, 3H] packed (r, z, n)   bih_ref/bhh_ref [1, 3H]
    #   out_ref [N, H]     hid_ref [B, H]          xg_scr [N, 3H]
    B, H = hid_ref.shape
    S = out_ref.shape[0] // B

    # ------------------ parallel (non-recurrent) phase ------------------
    x = x_ref[...]
    h1 = jnp.maximum(
        jnp.dot(x, w1_ref[...], preferred_element_type=jnp.float32)
        + b1_ref[...], 0.0)
    h2 = jnp.maximum(
        jnp.dot(h1, w2_ref[...], preferred_element_type=jnp.float32)
        + b2_ref[...], 0.0)
    feat = jnp.maximum(
        jnp.dot(h2, wl_ref[...], preferred_element_type=jnp.float32)
        + bl_ref[...], 0.0)
    # Input-side GRU matmul for ALL timesteps at once (hoisted out of the
    # serial recurrence).
    xg_scr[...] = (jnp.dot(feat, wih_ref[...],
                           preferred_element_type=jnp.float32)
                   + bih_ref[...])

    whh = whh_ref[...]
    bhh = bhh_ref[...]

    # ------------------ serial recurrence over time ------------------
    def step(t, h_prev):
        # Gather the B rows of timestep t (batch-major layout => rows b*S+t).
        xg_t = jnp.concatenate(
            [xg_scr[pl.ds(b * S + t, 1), :] for b in range(B)], axis=0)  # [B,3H]
        hg = jnp.dot(h_prev, whh, preferred_element_type=jnp.float32) + bhh
        r = jax.nn.sigmoid(xg_t[:, 0:H] + hg[:, 0:H])
        z = jax.nn.sigmoid(xg_t[:, H:2 * H] + hg[:, H:2 * H])
        n = jnp.tanh(xg_t[:, 2 * H:3 * H] + r * hg[:, 2 * H:3 * H])
        h_new = (1.0 - z) * n + z * h_prev
        for b in range(B):
            out_ref[pl.ds(b * S + t, 1), :] = h_new[b:b + 1, :]
        return h_new

    h_last = jax.lax.fori_loop(0, S, step,
                               jnp.zeros((B, H), jnp.float32),
                               unroll=True)
    hid_ref[...] = h_last


# ----------------------------------------------------------------------------
# Wrapper
# ----------------------------------------------------------------------------
@jax.jit
def encoder_forward(x, packed):
    B, S, P, D = x.shape
    H = packed["b_lin"].shape[-1]

    x_flat = x.reshape(B * S, P * D)          # contiguous reshape (free)
    out_flat, hid = pl.pallas_call(
        _encoder_kernel,
        out_shape=(jax.ShapeDtypeStruct((B * S, H), jnp.float32),
                   jax.ShapeDtypeStruct((B, H), jnp.float32)),
        scratch_shapes=[pltpu.VMEM((B * S, 3 * H), jnp.float32)],
    )(x_flat,
      packed["w1"], packed["b1"], packed["w2"], packed["b2"],
      packed["w_lin"], packed["b_lin"],
      packed["w_ih"], packed["b_ih"], packed["w_hh"], packed["b_hh"])

    output = out_flat.reshape(B, S, H)        # contiguous reshape (free)
    hidden = hid[None]                        # [1, B, H]
    return output, hidden


# ----------------------------------------------------------------------------
# Parameter init (PyTorch layout semantics) + packing for the kernel
# ----------------------------------------------------------------------------
def init_params(key, P, D, H):
    ks = jax.random.split(key, 10)

    def u(k, shape, fan_in):
        bound = 1.0 / float(fan_in) ** 0.5
        return jax.random.uniform(k, shape, jnp.float32, -bound, bound)

    return {
        # per-point MLPs: Linear(D,16) then Linear(16,8), stored transposed
        "w1": u(ks[0], (P, D, 16), D),
        "b1": u(ks[1], (P, 16), D),
        "w2": u(ks[2], (P, 16, 8), 16),
        "b2": u(ks[3], (P, 8), 16),
        # Linear(P*8, H)
        "w_lin": u(ks[4], (P * 8, H), P * 8),
        "b_lin": u(ks[5], (1, H), P * 8),
        # GRU gates (r, z, n), weights transposed to [H_in, H_out]
        "w_ih": u(ks[6], (3, H, H), H),
        "w_hh": u(ks[7], (3, H, H), H),
        "b_ih": u(ks[8], (3, 1, H), H),
        "b_hh": u(ks[9], (3, 1, H), H),
    }


def pack_params(p):
    """Pack per-point weights block-diagonally and GRU gates as [H, 3H]."""
    P, D, F1 = p["w1"].shape          # (P, D, 16)
    _, _, F2 = p["w2"].shape          # (P, 16, 8)

    w1_bd = jnp.zeros((P * D, P * F1), jnp.float32)
    w2_bd = jnp.zeros((P * F1, P * F2), jnp.float32)
    for i in range(P):
        w1_bd = w1_bd.at[i * D:(i + 1) * D, i * F1:(i + 1) * F1].set(p["w1"][i])
        w2_bd = w2_bd.at[i * F1:(i + 1) * F1, i * F2:(i + 1) * F2].set(p["w2"][i])

    return {
        "w1": w1_bd,
        "b1": p["b1"].reshape(1, P * F1),
        "w2": w2_bd,
        "b2": p["b2"].reshape(1, P * F2),
        "w_lin": p["w_lin"],
        "b_lin": p["b_lin"],
        "w_ih": jnp.concatenate([p["w_ih"][g] for g in range(3)], axis=1),
        "b_ih": jnp.concatenate([p["b_ih"][g] for g in range(3)], axis=1),
        "w_hh": jnp.concatenate([p["w_hh"][g] for g in range(3)], axis=1),
        "b_hh": jnp.concatenate([p["b_hh"][g] for g in range(3)], axis=1),
    }


# ----------------------------------------------------------------------------
# Pure-JAX reference (uses the unpacked per-point / per-gate parameters)
# ----------------------------------------------------------------------------
def ref_forward(x, params):
    B, S, P, D = x.shape
    H = params["b_lin"].shape[-1]
    xf = x.reshape(B * S, P, D)
    acc = jnp.zeros((B * S, H), jnp.float32)
    for p in range(P):
        h = jax.nn.relu(xf[:, p, :] @ params["w1"][p] + params["b1"][p])
        y = jax.nn.relu(h @ params["w2"][p] + params["b2"][p])
        acc = acc + y @ params["w_lin"][p * 8:(p + 1) * 8]
    feat = jax.nn.relu(acc + params["b_lin"]).reshape(B, S, H)

    h = jnp.zeros((B, H), jnp.float32)
    outs = []
    for t in range(S):
        xt = feat[:, t, :]
        r = jax.nn.sigmoid(xt @ params["w_ih"][0] + params["b_ih"][0]
                           + h @ params["w_hh"][0] + params["b_hh"][0])
        z = jax.nn.sigmoid(xt @ params["w_ih"][1] + params["b_ih"][1]
                           + h @ params["w_hh"][1] + params["b_hh"][1])
        n = jnp.tanh(xt @ params["w_ih"][2] + params["b_ih"][2]
                     + r * (h @ params["w_hh"][2] + params["b_hh"][2]))
        h = (1.0 - z) * n + z * h
        outs.append(h)
    return jnp.stack(outs, axis=1), h[None]


if __name__ == "__main__":
    B, S = 2, 8                 # batch, seq_length
    P, D = 4, 8                 # point_size = (4, 8)
    H = 32                      # hidden_size

    key = jax.random.PRNGKey(0)
    k_x, k_p = jax.random.split(key)
    x = jax.random.normal(k_x, (B, S, P, D), jnp.float32)
    params = init_params(k_p, P, D, H)
    packed = pack_params(params)        # packed once, outside the jitted fwd

    out, hid = encoder_forward(x, packed)
    jax.block_until_ready((out, hid))

    out_ref, hid_ref = ref_forward(x, params)
    assert out.shape == (B, S, H) and hid.shape == (1, B, H)
    assert jnp.allclose(out, out_ref, rtol=1e-4, atol=1e-4)
    assert jnp.allclose(hid, hid_ref, rtol=1e-4, atol=1e-4)

    print("KERNEL_OK")
</pallas_src>

<mosaic_0001>
module attributes {stable_mosaic.version = 11 : i64} {
  func.func @_encoder_kernel(%arg0: memref<16x32xf32, #tpu.memory_space<vmem>>, %arg1: memref<32x64xf32, #tpu.memory_space<vmem>>, %arg2: memref<1x64xf32, #tpu.memory_space<vmem>>, %arg3: memref<64x32xf32, #tpu.memory_space<vmem>>, %arg4: memref<1x32xf32, #tpu.memory_space<vmem>>, %arg5: memref<32x32xf32, #tpu.memory_space<vmem>>, %arg6: memref<1x32xf32, #tpu.memory_space<vmem>>, %arg7: memref<32x96xf32, #tpu.memory_space<vmem>>, %arg8: memref<1x96xf32, #tpu.memory_space<vmem>>, %arg9: memref<32x96xf32, #tpu.memory_space<vmem>>, %arg10: memref<1x96xf32, #tpu.memory_space<vmem>>, %arg11: memref<16x32xf32, #tpu.memory_space<vmem>>, %arg12: memref<2x32xf32, #tpu.memory_space<vmem>>, %arg13: memref<16x96xf32, #tpu.memory_space<vmem>>) attributes {dimension_semantics = [], scalar_prefetch = 0 : i64, scratch_operands = 1 : i64, tpu.core_type = #tpu.core_type<tc>} {
    %c0 = arith.constant 0 : index
    %c0_0 = arith.constant 0 : index
    %0 = vector.load %arg0[%c0, %c0_0] : memref<16x32xf32, #tpu.memory_space<vmem>>, vector<16x32xf32>
    %c0_1 = arith.constant 0 : index
    %c0_2 = arith.constant 0 : index
    %1 = vector.load %arg1[%c0_1, %c0_2] : memref<32x64xf32, #tpu.memory_space<vmem>>, vector<32x64xf32>
    %cst = arith.constant dense<0.000000e+00> : vector<16x64xf32>
    %2 = tpu.matmul %0, %1, %cst {dimension_numbers = #tpu.dot_dimension_numbers<[1], [0], [0], [1], [0, 0, 1, 1], [], []>} : vector<16x32xf32>, vector<32x64xf32>, vector<16x64xf32> -> vector<16x64xf32>
    %c0_3 = arith.constant 0 : index
    %c0_4 = arith.constant 0 : index
    %3 = vector.load %arg2[%c0_3, %c0_4] : memref<1x64xf32, #tpu.memory_space<vmem>>, vector<1x64xf32>
    %4 = vector.broadcast %3 : vector<1x64xf32> to vector<16x64xf32>
    %5 = arith.addf %2, %4 : vector<16x64xf32>
    %cst_5 = arith.constant 0.000000e+00 : f32
    %6 = vector.broadcast %cst_5 : f32 to vector<16x64xf32>
    %7 = arith.maximumf %5, %6 : vector<16x64xf32>
    %c0_6 = arith.constant 0 : index
    %c0_7 = arith.constant 0 : index
    %8 = vector.load %arg3[%c0_6, %c0_7] : memref<64x32xf32, #tpu.memory_space<vmem>>, vector<64x32xf32>
    %cst_8 = arith.constant dense<0.000000e+00> : vector<16x32xf32>
    %9 = tpu.matmul %7, %8, %cst_8 {dimension_numbers = #tpu.dot_dimension_numbers<[1], [0], [0], [1], [0, 0, 1, 1], [], []>} : vector<16x64xf32>, vector<64x32xf32>, vector<16x32xf32> -> vector<16x32xf32>
    %c0_9 = arith.constant 0 : index
    %c0_10 = arith.constant 0 : index
    %10 = vector.load %arg4[%c0_9, %c0_10] : memref<1x32xf32, #tpu.memory_space<vmem>>, vector<1x32xf32>
    %11 = vector.broadcast %10 : vector<1x32xf32> to vector<16x32xf32>
    %12 = arith.addf %9, %11 : vector<16x32xf32>
    %cst_11 = arith.constant 0.000000e+00 : f32
    %13 = vector.broadcast %cst_11 : f32 to vector<16x32xf32>
    %14 = arith.maximumf %12, %13 : vector<16x32xf32>
    %c0_12 = arith.constant 0 : index
    %c0_13 = arith.constant 0 : index
    %15 = vector.load %arg5[%c0_12, %c0_13] : memref<32x32xf32, #tpu.memory_space<vmem>>, vector<32x32xf32>
    %cst_14 = arith.constant dense<0.000000e+00> : vector<16x32xf32>
    %16 = tpu.matmul %14, %15, %cst_14 {dimension_numbers = #tpu.dot_dimension_numbers<[1], [0], [0], [1], [0, 0, 1, 1], [], []>} : vector<16x32xf32>, vector<32x32xf32>, vector<16x32xf32> -> vector<16x32xf32>
    %c0_15 = arith.constant 0 : index
    %c0_16 = arith.constant 0 : index
    %17 = vector.load %arg6[%c0_15, %c0_16] : memref<1x32xf32, #tpu.memory_space<vmem>>, vector<1x32xf32>
    %18 = vector.broadcast %17 : vector<1x32xf32> to vector<16x32xf32>
    %19 = arith.addf %16, %18 : vector<16x32xf32>
    %cst_17 = arith.constant 0.000000e+00 : f32
    %20 = vector.broadcast %cst_17 : f32 to vector<16x32xf32>
    %21 = arith.maximumf %19, %20 : vector<16x32xf32>
    %c0_18 = arith.constant 0 : index
    %c0_19 = arith.constant 0 : index
    %22 = vector.load %arg7[%c0_18, %c0_19] : memref<32x96xf32, #tpu.memory_space<vmem>>, vector<32x96xf32>
    %cst_20 = arith.constant dense<0.000000e+00> : vector<16x96xf32>
    %23 = tpu.matmul %21, %22, %cst_20 {dimension_numbers = #tpu.dot_dimension_numbers<[1], [0], [0], [1], [0, 0, 1, 1], [], []>} : vector<16x32xf32>, vector<32x96xf32>, vector<16x96xf32> -> vector<16x96xf32>
    %c0_21 = arith.constant 0 : index
    %c0_22 = arith.constant 0 : index
    %24 = vector.load %arg8[%c0_21, %c0_22] : memref<1x96xf32, #tpu.memory_space<vmem>>, vector<1x96xf32>
    %25 = vector.broadcast %24 : vector<1x96xf32> to vector<16x96xf32>
    %26 = arith.addf %23, %25 : vector<16x96xf32>
    %c0_23 = arith.constant 0 : index
    %c0_24 = arith.constant 0 : index
    %27 = vector.load %arg13[%c0_23, %c0_24] : memref<16x96xf32, #tpu.memory_space<vmem>>, vector<16x96xf32>
    tpu.vector_store %arg13[%c0_23, %c0_24], %26 {strides = array<i32>} : memref<16x96xf32, #tpu.memory_space<vmem>>, vector<16x96xf32>,
    %c0_25 = arith.constant 0 : index
    %c0_26 = arith.constant 0 : index
    %28 = vector.load %arg9[%c0_25, %c0_26] : memref<32x96xf32, #tpu.memory_space<vmem>>, vector<32x96xf32>
    %c0_27 = arith.constant 0 : index
    %c0_28 = arith.constant 0 : index
    %29 = vector.load %arg10[%c0_27, %c0_28] : memref<1x96xf32, #tpu.memory_space<vmem>>, vector<1x96xf32>
    %cst_29 = arith.constant 0.000000e+00 : f32
    %30 = vector.broadcast %cst_29 : f32 to vector<2x32xf32>
    %c0_i32 = arith.constant 0 : i32
    %c0_i32_30 = arith.constant 0 : i32
    %31 = arith.addi %c0_i32_30, %c0_i32 : i32
    %32 = arith.index_cast %31 : i32 to index
    %c0_31 = arith.constant 0 : index
    %33 = vector.load %arg13[%32, %c0_31] : memref<16x96xf32, #tpu.memory_space<vmem>>, vector<1x96xf32>
    %c8_i32 = arith.constant 8 : i32
    %34 = arith.addi %c8_i32, %c0_i32 : i32
    %35 = arith.index_cast %34 : i32 to index
    %c0_32 = arith.constant 0 : index
    %36 = vector.load %arg13[%35, %c0_32] : memref<16x96xf32, #tpu.memory_space<vmem>>, vector<1x96xf32>
    %37 = tpu.concatenate %33, %36 in 0 : vector<1x96xf32>, vector<1x96xf32> -> vector<2x96xf32>
    %cst_33 = arith.constant dense<0.000000e+00> : vector<2x96xf32>
    %38 = tpu.matmul %30, %28, %cst_33 {dimension_numbers = #tpu.dot_dimension_numbers<[1], [0], [0], [1], [0, 0, 1, 1], [], []>} : vector<2x32xf32>, vector<32x96xf32>, vector<2x96xf32> -> vector<2x96xf32>
    %39 = vector.broadcast %29 : vector<1x96xf32> to vector<2x96xf32>
    %40 = arith.addf %38, %39 : vector<2x96xf32>
    %41 = vector.extract_strided_slice %37 {offsets = [0, 0], sizes = [2, 32], strides = [1, 1]} : vector<2x96xf32> to vector<2x32xf32>
    %42 = vector.extract_strided_slice %40 {offsets = [0, 0], sizes = [2, 32], strides = [1, 1]} : vector<2x96xf32> to vector<2x32xf32>
    %43 = arith.addf %41, %42 : vector<2x32xf32>
    %44 = arith.negf %43 : vector<2x32xf32>
    %45 = math.exp %44 : vector<2x32xf32>
    %cst_34 = arith.constant 1.000000e+00 : f32
    %46 = vector.broadcast %cst_34 : f32 to vector<2x32xf32>
    %47 = arith.addf %46, %45 : vector<2x32xf32>
    %48 = arith.divf %46, %47 : vector<2x32xf32>
    %49 = vector.extract_strided_slice %37 {offsets = [0, 32], sizes = [2, 32], strides = [1, 1]} : vector<2x96xf32> to vector<2x32xf32>
    %50 = vector.extract_strided_slice %40 {offsets = [0, 32], sizes = [2, 32], strides = [1, 1]} : vector<2x96xf32> to vector<2x32xf32>
    %51 = arith.addf %49, %50 : vector<2x32xf32>
    %52 = arith.negf %51 : vector<2x32xf32>
    %53 = math.exp %52 : vector<2x32xf32>
    %cst_35 = arith.constant 1.000000e+00 : f32
    %54 = vector.broadcast %cst_35 : f32 to vector<2x32xf32>
    %55 = arith.addf %54, %53 : vector<2x32xf32>
    %56 = arith.divf %54, %55 : vector<2x32xf32>
    %57 = vector.extract_strided_slice %37 {offsets = [0, 64], sizes = [2, 32], strides = [1, 1]} : vector<2x96xf32> to vector<2x32xf32>
    %58 = vector.extract_strided_slice %40 {offsets = [0, 64], sizes = [2, 32], strides = [1, 1]} : vector<2x96xf32> to vector<2x32xf32>
    %59 = arith.mulf %48, %58 : vector<2x32xf32>
    %60 = arith.addf %57, %59 : vector<2x32xf32>
    %61 = math.tanh %60 : vector<2x32xf32>
    %cst_36 = arith.constant 1.000000e+00 : f32
    %62 = vector.broadcast %cst_36 : f32 to vector<2x32xf32>
    %63 = arith.subf %62, %56 : vector<2x32xf32>
    %64 = arith.mulf %63, %61 : vector<2x32xf32>
    %65 = arith.mulf %56, %30 : vector<2x32xf32>
    %66 = arith.addf %64, %65 : vector<2x32xf32>
    %67 = vector.extract_strided_slice %66 {offsets = [0, 0], sizes = [1, 32], strides = [1, 1]} : vector<2x32xf32> to vector<1x32xf32>
    %c0_i32_37 = arith.constant 0 : i32
    %68 = arith.addi %c0_i32_37, %c0_i32 : i32
    %69 = arith.index_cast %68 : i32 to index
    %c0_38 = arith.constant 0 : index
    %70 = vector.load %arg11[%69, %c0_38] : memref<16x32xf32, #tpu.memory_space<vmem>>, vector<1x32xf32>
    tpu.vector_store %arg11[%69, %c0_38], %67 {strides = array<i32>} : memref<16x32xf32, #tpu.memory_space<vmem>>, vector<1x32xf32>,
    %71 = vector.extract_strided_slice %66 {offsets = [1, 0], sizes = [1, 32], strides = [1, 1]} : vector<2x32xf32> to vector<1x32xf32>
    %c8_i32_39 = arith.constant 8 : i32
    %72 = arith.addi %c8_i32_39, %c0_i32 : i32
    %73 = arith.index_cast %72 : i32 to index
    %c0_40 = arith.constant 0 : index
    %74 = vector.load %arg11[%73, %c0_40] : memref<16x32xf32, #tpu.memory_space<vmem>>, vector<1x32xf32>
    tpu.vector_store %arg11[%73, %c0_40], %71 {strides = array<i32>} : memref<16x32xf32, #tpu.memory_space<vmem>>, vector<1x32xf32>,
    %c1_i32 = arith.constant 1 : i32
    %c0_i32_41 = arith.constant 0 : i32
    %75 = arith.addi %c0_i32_41, %c1_i32 : i32
    %76 = arith.index_cast %75 : i32 to index
    %c0_42 = arith.constant 0 : index
    %77 = vector.load %arg13[%76, %c0_42] : memref<16x96xf32, #tpu.memory_space<vmem>>, vector<1x96xf32>
    %c8_i32_43 = arith.constant 8 : i32
    %78 = arith.addi %c8_i32_43, %c1_i32 : i32
    %79 = arith.index_cast %78 : i32 to index
    %c0_44 = arith.constant 0 : index
    %80 = vector.load %arg13[%79, %c0_44] : memref<16x96xf32, #tpu.memory_space<vmem>>, vector<1x96xf32>
    %81 = tpu.concatenate %77, %80 in 0 : vector<1x96xf32>, vector<1x96xf32> -> vector<2x96xf32>
    %cst_45 = arith.constant dense<0.000000e+00> : vector<2x96xf32>
    %82 = tpu.matmul %66, %28, %cst_45 {dimension_numbers = #tpu.dot_dimension_numbers<[1], [0], [0], [1], [0, 0, 1, 1], [], []>} : vector<2x32xf32>, vector<32x96xf32>, vector<2x96xf32> -> vector<2x96xf32>
    %83 = vector.broadcast %29 : vector<1x96xf32> to vector<2x96xf32>
    %84 = arith.addf %82, %83 : vector<2x96xf32>
    %85 = vector.extract_strided_slice %81 {offsets = [0, 0], sizes = [2, 32], strides = [1, 1]} : vector<2x96xf32> to vector<2x32xf32>
    %86 = vector.extract_strided_slice %84 {offsets = [0, 0], sizes = [2, 32], strides = [1, 1]} : vector<2x96xf32> to vector<2x32xf32>
    %87 = arith.addf %85, %86 : vector<2x32xf32>
    %88 = arith.negf %87 : vector<2x32xf32>
    %89 = math.exp %88 : vector<2x32xf32>
    %cst_46 = arith.constant 1.000000e+00 : f32
    %90 = vector.broadcast %cst_46 : f32 to vector<2x32xf32>
    %91 = arith.addf %90, %89 : vector<2x32xf32>
    %92 = arith.divf %90, %91 : vector<2x32xf32>
    %93 = vector.extract_strided_slice %81 {offsets = [0, 32], sizes = [2, 32], strides = [1, 1]} : vector<2x96xf32> to vector<2x32xf32>
    %94 = vector.extract_strided_slice %84 {offsets = [0, 32], sizes = [2, 32], strides = [1, 1]} : vector<2x96xf32> to vector<2x32xf32>
    %95 = arith.addf %93, %94 : vector<2x32xf32>
    %96 = arith.negf %95 : vector<2x32xf32>
    %97 = math.exp %96 : vector<2x32xf32>
    %cst_47 = arith.constant 1.000000e+00 : f32
    %98 = vector.broadcast %cst_47 : f32 to vector<2x32xf32>
    %99 = arith.addf %98, %97 : vector<2x32xf32>
    %100 = arith.divf %98, %99 : vector<2x32xf32>
    %101 = vector.extract_strided_slice %81 {offsets = [0, 64], sizes = [2, 32], strides = [1, 1]} : vector<2x96xf32> to vector<2x32xf32>
    %102 = vector.extract_strided_slice %84 {offsets = [0, 64], sizes = [2, 32], strides = [1, 1]} : vector<2x96xf32> to vector<2x32xf32>
    %103 = arith.mulf %92, %102 : vector<2x32xf32>
    %104 = arith.addf %101, %103 : vector<2x32xf32>
    %105 = math.tanh %104 : vector<2x32xf32>
    %cst_48 = arith.constant 1.000000e+00 : f32
    %106 = vector.broadcast %cst_48 : f32 to vector<2x32xf32>
    %107 = arith.subf %106, %100 : vector<2x32xf32>
    %108 = arith.mulf %107, %105 : vector<2x32xf32>
    %109 = arith.mulf %100, %66 : vector<2x32xf32>
    %110 = arith.addf %108, %109 : vector<2x32xf32>
    %111 = vector.extract_strided_slice %110 {offsets = [0, 0], sizes = [1, 32], strides = [1, 1]} : vector<2x32xf32> to vector<1x32xf32>
    %c0_i32_49 = arith.constant 0 : i32
    %112 = arith.addi %c0_i32_49, %c1_i32 : i32
    %113 = arith.index_cast %112 : i32 to index
    %c0_50 = arith.constant 0 : index
    %114 = vector.load %arg11[%113, %c0_50] : memref<16x32xf32, #tpu.memory_space<vmem>>, vector<1x32xf32>
    tpu.vector_store %arg11[%113, %c0_50], %111 {strides = array<i32>} : memref<16x32xf32, #tpu.memory_space<vmem>>, vector<1x32xf32>,
    %115 = vector.extract_strided_slice %110 {offsets = [1, 0], sizes = [1, 32], strides = [1, 1]} : vector<2x32xf32> to vector<1x32xf32>
    %c8_i32_51 = arith.constant 8 : i32
    %116 = arith.addi %c8_i32_51, %c1_i32 : i32
    %117 = arith.index_cast %116 : i32 to index
    %c0_52 = arith.constant 0 : index
    %118 = vector.load %arg11[%117, %c0_52] : memref<16x32xf32, #tpu.memory_space<vmem>>, vector<1x32xf32>
    tpu.vector_store %arg11[%117, %c0_52], %115 {strides = array<i32>} : memref<16x32xf32, #tpu.memory_space<vmem>>, vector<1x32xf32>,
    %c2_i32 = arith.constant 2 : i32
    %c0_i32_53 = arith.constant 0 : i32
    %119 = arith.addi %c0_i32_53, %c2_i32 : i32
    %120 = arith.index_cast %119 : i32 to index
    %c0_54 = arith.constant 0 : index
    %121 = vector.load %arg13[%120, %c0_54] : memref<16x96xf32, #tpu.memory_space<vmem>>, vector<1x96xf32>
    %c8_i32_55 = arith.constant 8 : i32
    %122 = arith.addi %c8_i32_55, %c2_i32 : i32
    %123 = arith.index_cast %122 : i32 to index
    %c0_56 = arith.constant 0 : index
    %124 = vector.load %arg13[%123, %c0_56] : memref<16x96xf32, #tpu.memory_space<vmem>>, vector<1x96xf32>
    %125 = tpu.concatenate %121, %124 in 0 : vector<1x96xf32>, vector<1x96xf32> -> vector<2x96xf32>
    %cst_57 = arith.constant dense<0.000000e+00> : vector<2x96xf32>
    %126 = tpu.matmul %110, %28, %cst_57 {dimension_numbers = #tpu.dot_dimension_numbers<[1], [0], [0], [1], [0, 0, 1, 1], [], []>} : vector<2x32xf32>, vector<32x96xf32>, vector<2x96xf32> -> vector<2x96xf32>
    %127 = vector.broadcast %29 : vector<1x96xf32> to vector<2x96xf32>
    %128 = arith.addf %126, %127 : vector<2x96xf32>
    %129 = vector.extract_strided_slice %125 {offsets = [0, 0], sizes = [2, 32], strides = [1, 1]} : vector<2x96xf32> to vector<2x32xf32>
    %130 = vector.extract_strided_slice %128 {offsets = [0, 0], sizes = [2, 32], strides = [1, 1]} : vector<2x96xf32> to vector<2x32xf32>
    %131 = arith.addf %129, %130 : vector<2x32xf32>
    %132 = arith.negf %131 : vector<2x32xf32>
    %133 = math.exp %132 : vector<2x32xf32>
    %cst_58 = arith.constant 1.000000e+00 : f32
    %134 = vector.broadcast %cst_58 : f32 to vector<2x32xf32>
    %135 = arith.addf %134, %133 : vector<2x32xf32>
    %136 = arith.divf %134, %135 : vector<2x32xf32>
    %137 = vector.extract_strided_slice %125 {offsets = [0, 32], sizes = [2, 32], strides = [1, 1]} : vector<2x96xf32> to vector<2x32xf32>
    %138 = vector.extract_strided_slice %128 {offsets = [0, 32], sizes = [2, 32], strides = [1, 1]} : vector<2x96xf32> to vector<2x32xf32>
    %139 = arith.addf %137, %138 : vector<2x32xf32>
    %140 = arith.negf %139 : vector<2x32xf32>
    %141 = math.exp %140 : vector<2x32xf32>
    %cst_59 = arith.constant 1.000000e+00 : f32
    %142 = vector.broadcast %cst_59 : f32 to vector<2x32xf32>
    %143 = arith.addf %142, %141 : vector<2x32xf32>
    %144 = arith.divf %142, %143 : vector<2x32xf32>
    %145 = vector.extract_strided_slice %125 {offsets = [0, 64], sizes = [2, 32], strides = [1, 1]} : vector<2x96xf32> to vector<2x32xf32>
    %146 = vector.extract_strided_slice %128 {offsets = [0, 64], sizes = [2, 32], strides = [1, 1]} : vector<2x96xf32> to vector<2x32xf32>
    %147 = arith.mulf %136, %146 : vector<2x32xf32>
    %148 = arith.addf %145, %147 : vector<2x32xf32>
    %149 = math.tanh %148 : vector<2x32xf32>
    %cst_60 = arith.constant 1.000000e+00 : f32
    %150 = vector.broadcast %cst_60 : f32 to vector<2x32xf32>
    %151 = arith.subf %150, %144 : vector<2x32xf32>
    %152 = arith.mulf %151, %149 : vector<2x32xf32>
    %153 = arith.mulf %144, %110 : vector<2x32xf32>
    %154 = arith.addf %152, %153 : vector<2x32xf32>
    %155 = vector.extract_strided_slice %154 {offsets = [0, 0], sizes = [1, 32], strides = [1, 1]} : vector<2x32xf32> to vector<1x32xf32>
    %c0_i32_61 = arith.constant 0 : i32
    %156 = arith.addi %c0_i32_61, %c2_i32 : i32
    %157 = arith.index_cast %156 : i32 to index
    %c0_62 = arith.constant 0 : index
    %158 = vector.load %arg11[%157, %c0_62] : memref<16x32xf32, #tpu.memory_space<vmem>>, vector<1x32xf32>
    tpu.vector_store %arg11[%157, %c0_62], %155 {strides = array<i32>} : memref<16x32xf32, #tpu.memory_space<vmem>>, vector<1x32xf32>,
    %159 = vector.extract_strided_slice %154 {offsets = [1, 0], sizes = [1, 32], strides = [1, 1]} : vector<2x32xf32> to vector<1x32xf32>
    %c8_i32_63 = arith.constant 8 : i32
    %160 = arith.addi %c8_i32_63, %c2_i32 : i32
    %161 = arith.index_cast %160 : i32 to index
    %c0_64 = arith.constant 0 : index
    %162 = vector.load %arg11[%161, %c0_64] : memref<16x32xf32, #tpu.memory_space<vmem>>, vector<1x32xf32>
    tpu.vector_store %arg11[%161, %c0_64], %159 {strides = array<i32>} : memref<16x32xf32, #tpu.memory_space<vmem>>, vector<1x32xf32>,
    %c3_i32 = arith.constant 3 : i32
    %c0_i32_65 = arith.constant 0 : i32
    %163 = arith.addi %c0_i32_65, %c3_i32 : i32
    %164 = arith.index_cast %163 : i32 to index
    %c0_66 = arith.constant 0 : index
    %165 = vector.load %arg13[%164, %c0_66] : memref<16x96xf32, #tpu.memory_space<vmem>>, vector<1x96xf32>
    %c8_i32_67 = arith.constant 8 : i32
    %166 = arith.addi %c8_i32_67, %c3_i32 : i32
    %167 = arith.index_cast %166 : i32 to index
    %c0_68 = arith.constant 0 : index
    %168 = vector.load %arg13[%167, %c0_68] : memref<16x96xf32, #tpu.memory_space<vmem>>, vector<1x96xf32>
    %169 = tpu.concatenate %165, %168 in 0 : vector<1x96xf32>, vector<1x96xf32> -> vector<2x96xf32>
    %cst_69 = arith.constant dense<0.000000e+00> : vector<2x96xf32>
    %170 = tpu.matmul %154, %28, %cst_69 {dimension_numbers = #tpu.dot_dimension_numbers<[1], [0], [0], [1], [0, 0, 1, 1], [], []>} : vector<2x32xf32>, vector<32x96xf32>, vector<2x96xf32> -> vector<2x96xf32>
    %171 = vector.broadcast %29 : vector<1x96xf32> to vector<2x96xf32>
    %172 = arith.addf %170, %171 : vector<2x96xf32>
    %173 = vector.extract_strided_slice %169 {offsets = [0, 0], sizes = [2, 32], strides = [1, 1]} : vector<2x96xf32> to vector<2x32xf32>
    %174 = vector.extract_strided_slice %172 {offsets = [0, 0], sizes = [2, 32], strides = [1, 1]} : vector<2x96xf32> to vector<2x32xf32>
    %175 = arith.addf %173, %174 : vector<2x32xf32>
    %176 = arith.negf %175 : vector<2x32xf32>
    %177 = math.exp %176 : vector<2x32xf32>
    %cst_70 = arith.constant 1.000000e+00 : f32
    %178 = vector.broadcast %cst_70 : f32 to vector<2x32xf32>
    %179 = arith.addf %178, %177 : vector<2x32xf32>
    %180 = arith.divf %178, %179 : vector<2x32xf32>
    %181 = vector.extract_strided_slice %169 {offsets = [0, 32], sizes = [2, 32], strides = [1, 1]} : vector<2x96xf32> to vector<2x32xf32>
    %182 = vector.extract_strided_slice %172 {offsets = [0, 32], sizes = [2, 32], strides = [1, 1]} : vector<2x96xf32> to vector<2x32xf32>
    %183 = arith.addf %181, %182 : vector<2x32xf32>
    %184 = arith.negf %183 : vector<2x32xf32>
    %185 = math.exp %184 : vector<2x32xf32>
    %cst_71 = arith.constant 1.000000e+00 : f32
    %186 = vector.broadcast %cst_71 : f32 to vector<2x32xf32>
    %187 = arith.addf %186, %185 : vector<2x32xf32>
    %188 = arith.divf %186, %187 : vector<2x32xf32>
    %189 = vector.extract_strided_slice %169 {offsets = [0, 64], sizes = [2, 32], strides = [1, 1]} : vector<2x96xf32> to vector<2x32xf32>
    %190 = vector.extract_strided_slice %172 {offsets = [0, 64], sizes = [2, 32], strides = [1, 1]} : vector<2x96xf32> to vector<2x32xf32>
    %191 = arith.mulf %180, %190 : vector<2x32xf32>
    %192 = arith.addf %189, %191 : vector<2x32xf32>
    %193 = math.tanh %192 : vector<2x32xf32>
    %cst_72 = arith.constant 1.000000e+00 : f32
    %194 = vector.broadcast %cst_72 : f32 to vector<2x32xf32>
    %195 = arith.subf %194, %188 : vector<2x32xf32>
    %196 = arith.mulf %195, %193 : vector<2x32xf32>
    %197 = arith.mulf %188, %154 : vector<2x32xf32>
    %198 = arith.addf %196, %197 : vector<2x32xf32>
    %199 = vector.extract_strided_slice %198 {offsets = [0, 0], sizes = [1, 32], strides = [1, 1]} : vector<2x32xf32> to vector<1x32xf32>
    %c0_i32_73 = arith.constant 0 : i32
    %200 = arith.addi %c0_i32_73, %c3_i32 : i32
    %201 = arith.index_cast %200 : i32 to index
    %c0_74 = arith.constant 0 : index
    %202 = vector.load %arg11[%201, %c0_74] : memref<16x32xf32, #tpu.memory_space<vmem>>, vector<1x32xf32>
    tpu.vector_store %arg11[%201, %c0_74], %199 {strides = array<i32>} : memref<16x32xf32, #tpu.memory_space<vmem>>, vector<1x32xf32>,
    %203 = vector.extract_strided_slice %198 {offsets = [1, 0], sizes = [1, 32], strides = [1, 1]} : vector<2x32xf32> to vector<1x32xf32>
    %c8_i32_75 = arith.constant 8 : i32
    %204 = arith.addi %c8_i32_75, %c3_i32 : i32
    %205 = arith.index_cast %204 : i32 to index
    %c0_76 = arith.constant 0 : index
    %206 = vector.load %arg11[%205, %c0_76] : memref<16x32xf32, #tpu.memory_space<vmem>>, vector<1x32xf32>
    tpu.vector_store %arg11[%205, %c0_76], %203 {strides = array<i32>} : memref<16x32xf32, #tpu.memory_space<vmem>>, vector<1x32xf32>,
    %c4_i32 = arith.constant 4 : i32
    %c0_i32_77 = arith.constant 0 : i32
    %207 = arith.addi %c0_i32_77, %c4_i32 : i32
    %208 = arith.index_cast %207 : i32 to index
    %c0_78 = arith.constant 0 : index
    %209 = vector.load %arg13[%208, %c0_78] : memref<16x96xf32, #tpu.memory_space<vmem>>, vector<1x96xf32>
    %c8_i32_79 = arith.constant 8 : i32
    %210 = arith.addi %c8_i32_79, %c4_i32 : i32
    %211 = arith.index_cast %210 : i32 to index
    %c0_80 = arith.constant 0 : index
    %212 = vector.load %arg13[%211, %c0_80] : memref<16x96xf32, #tpu.memory_space<vmem>>, vector<1x96xf32>
    %213 = tpu.concatenate %209, %212 in 0 : vector<1x96xf32>, vector<1x96xf32> -> vector<2x96xf32>
    %cst_81 = arith.constant dense<0.000000e+00> : vector<2x96xf32>
    %214 = tpu.matmul %198, %28, %cst_81 {dimension_numbers = #tpu.dot_dimension_numbers<[1], [0], [0], [1], [0, 0, 1, 1], [], []>} : vector<2x32xf32>, vector<32x96xf32>, vector<2x96xf32> -> vector<2x96xf32>
    %215 = vector.broadcast %29 : vector<1x96xf32> to vector<2x96xf32>
    %216 = arith.addf %214, %215 : vector<2x96xf32>
    %217 = vector.extract_strided_slice %213 {offsets = [0, 0], sizes = [2, 32], strides = [1, 1]} : vector<2x96xf32> to vector<2x32xf32>
    %218 = vector.extract_strided_slice %216 {offsets = [0, 0], sizes = [2, 32], strides = [1, 1]} : vector<2x96xf32> to vector<2x32xf32>
    %219 = arith.addf %217, %218 : vector<2x32xf32>
    %220 = arith.negf %219 : vector<2x32xf32>
    %221 = math.exp %220 : vector<2x32xf32>
    %cst_82 = arith.constant 1.000000e+00 : f32
    %222 = vector.broadcast %cst_82 : f32 to vector<2x32xf32>
    %223 = arith.addf %222, %221 : vector<2x32xf32>
    %224 = arith.divf %222, %223 : vector<2x32xf32>
    %225 = vector.extract_strided_slice %213 {offsets = [0, 32], sizes = [2, 32], strides = [1, 1]} : vector<2x96xf32> to vector<2x32xf32>
    %226 = vector.extract_strided_slice %216 {offsets = [0, 32], sizes = [2, 32], strides = [1, 1]} : vector<2x96xf32> to vector<2x32xf32>
    %227 = arith.addf %225, %226 : vector<2x32xf32>
    %228 = arith.negf %227 : vector<2x32xf32>
    %229 = math.exp %228 : vector<2x32xf32>
    %cst_83 = arith.constant 1.000000e+00 : f32
    %230 = vector.broadcast %cst_83 : f32 to vector<2x32xf32>
    %231 = arith.addf %230, %229 : vector<2x32xf32>
    %232 = arith.divf %230, %231 : vector<2x32xf32>
    %233 = vector.extract_strided_slice %213 {offsets = [0, 64], sizes = [2, 32], strides = [1, 1]} : vector<2x96xf32> to vector<2x32xf32>
    %234 = vector.extract_strided_slice %216 {offsets = [0, 64], sizes = [2, 32], strides = [1, 1]} : vector<2x96xf32> to vector<2x32xf32>
    %235 = arith.mulf %224, %234 : vector<2x32xf32>
    %236 = arith.addf %233, %235 : vector<2x32xf32>
    %237 = math.tanh %236 : vector<2x32xf32>
    %cst_84 = arith.constant 1.000000e+00 : f32
    %238 = vector.broadcast %cst_84 : f32 to vector<2x32xf32>
    %239 = arith.subf %238, %232 : vector<2x32xf32>
    %240 = arith.mulf %239, %237 : vector<2x32xf32>
    %241 = arith.mulf %232, %198 : vector<2x32xf32>
    %242 = arith.addf %240, %241 : vector<2x32xf32>
    %243 = vector.extract_strided_slice %242 {offsets = [0, 0], sizes = [1, 32], strides = [1, 1]} : vector<2x32xf32> to vector<1x32xf32>
    %c0_i32_85 = arith.constant 0 : i32
    %244 = arith.addi %c0_i32_85, %c4_i32 : i32
    %245 = arith.index_cast %244 : i32 to index
    %c0_86 = arith.constant 0 : index
    %246 = vector.load %arg11[%245, %c0_86] : memref<16x32xf32, #tpu.memory_space<vmem>>, vector<1x32xf32>
    tpu.vector_store %arg11[%245, %c0_86], %243 {strides = array<i32>} : memref<16x32xf32, #tpu.memory_space<vmem>>, vector<1x32xf32>,
    %247 = vector.extract_strided_slice %242 {offsets = [1, 0], sizes = [1, 32], strides = [1, 1]} : vector<2x32xf32> to vector<1x32xf32>
    %c8_i32_87 = arith.constant 8 : i32
    %248 = arith.addi %c8_i32_87, %c4_i32 : i32
    %249 = arith.index_cast %248 : i32 to index
    %c0_88 = arith.constant 0 : index
    %250 = vector.load %arg11[%249, %c0_88] : memref<16x32xf32, #tpu.memory_space<vmem>>, vector<1x32xf32>
    tpu.vector_store %arg11[%249, %c0_88], %247 {strides = array<i32>} : memref<16x32xf32, #tpu.memory_space<vmem>>, vector<1x32xf32>,
    %c5_i32 = arith.constant 5 : i32
    %c0_i32_89 = arith.constant 0 : i32
    %251 = arith.addi %c0_i32_89, %c5_i32 : i32
    %252 = arith.index_cast %251 : i32 to index
    %c0_90 = arith.constant 0 : index
    %253 = vector.load %arg13[%252, %c0_90] : memref<16x96xf32, #tpu.memory_space<vmem>>, vector<1x96xf32>
    %c8_i32_91 = arith.constant 8 : i32
    %254 = arith.addi %c8_i32_91, %c5_i32 : i32
    %255 = arith.index_cast %254 : i32 to index
    %c0_92 = arith.constant 0 : index
    %256 = vector.load %arg13[%255, %c0_92] : memref<16x96xf32, #tpu.memory_space<vmem>>, vector<1x96xf32>
    %257 = tpu.concatenate %253, %256 in 0 : vector<1x96xf32>, vector<1x96xf32> -> vector<2x96xf32>
    %cst_93 = arith.constant dense<0.000000e+00> : vector<2x96xf32>
    %258 = tpu.matmul %242, %28, %cst_93 {dimension_numbers = #tpu.dot_dimension_numbers<[1], [0], [0], [1], [0, 0, 1, 1], [], []>} : vector<2x32xf32>, vector<32x96xf32>, vector<2x96xf32> -> vector<2x96xf32>
    %259 = vector.broadcast %29 : vector<1x96xf32> to vector<2x96xf32>
    %260 = arith.addf %258, %259 : vector<2x96xf32>
    %261 = vector.extract_strided_slice %257 {offsets = [0, 0], sizes = [2, 32], strides = [1, 1]} : vector<2x96xf32> to vector<2x32xf32>
    %262 = vector.extract_strided_slice %260 {offsets = [0, 0], sizes = [2, 32], strides = [1, 1]} : vector<2x96xf32> to vector<2x32xf32>
    %263 = arith.addf %261, %262 : vector<2x32xf32>
    %264 = arith.negf %263 : vector<2x32xf32>
    %265 = math.exp %264 : vector<2x32xf32>
    %cst_94 = arith.constant 1.000000e+00 : f32
    %266 = vector.broadcast %cst_94 : f32 to vector<2x32xf32>
    %267 = arith.addf %266, %265 : vector<2x32xf32>
    %268 = arith.divf %266, %267 : vector<2x32xf32>
    %269 = vector.extract_strided_slice %257 {offsets = [0, 32], sizes = [2, 32], strides = [1, 1]} : vector<2x96xf32> to vector<2x32xf32>
    %270 = vector.extract_strided_slice %260 {offsets = [0, 32], sizes = [2, 32], strides = [1, 1]} : vector<2x96xf32> to vector<2x32xf32>
    %271 = arith.addf %269, %270 : vector<2x32xf32>
    %272 = arith.negf %271 : vector<2x32xf32>
    %273 = math.exp %272 : vector<2x32xf32>
    %cst_95 = arith.constant 1.000000e+00 : f32
    %274 = vector.broadcast %cst_95 : f32 to vector<2x32xf32>
    %275 = arith.addf %274, %273 : vector<2x32xf32>
    %276 = arith.divf %274, %275 : vector<2x32xf32>
    %277 = vector.extract_strided_slice %257 {offsets = [0, 64], sizes = [2, 32], strides = [1, 1]} : vector<2x96xf32> to vector<2x32xf32>
    %278 = vector.extract_strided_slice %260 {offsets = [0, 64], sizes = [2, 32], strides = [1, 1]} : vector<2x96xf32> to vector<2x32xf32>
    %279 = arith.mulf %268, %278 : vector<2x32xf32>
    %280 = arith.addf %277, %279 : vector<2x32xf32>
    %281 = math.tanh %280 : vector<2x32xf32>
    %cst_96 = arith.constant 1.000000e+00 : f32
    %282 = vector.broadcast %cst_96 : f32 to vector<2x32xf32>
    %283 = arith.subf %282, %276 : vector<2x32xf32>
    %284 = arith.mulf %283, %281 : vector<2x32xf32>
    %285 = arith.mulf %276, %242 : vector<2x32xf32>
    %286 = arith.addf %284, %285 : vector<2x32xf32>
    %287 = vector.extract_strided_slice %286 {offsets = [0, 0], sizes = [1, 32], strides = [1, 1]} : vector<2x32xf32> to vector<1x32xf32>
    %c0_i32_97 = arith.constant 0 : i32
    %288 = arith.addi %c0_i32_97, %c5_i32 : i32
    %289 = arith.index_cast %288 : i32 to index
    %c0_98 = arith.constant 0 : index
    %290 = vector.load %arg11[%289, %c0_98] : memref<16x32xf32, #tpu.memory_space<vmem>>, vector<1x32xf32>
    tpu.vector_store %arg11[%289, %c0_98], %287 {strides = array<i32>} : memref<16x32xf32, #tpu.memory_space<vmem>>, vector<1x32xf32>,
    %291 = vector.extract_strided_slice %286 {offsets = [1, 0], sizes = [1, 32], strides = [1, 1]} : vector<2x32xf32> to vector<1x32xf32>
    %c8_i32_99 = arith.constant 8 : i32
    %292 = arith.addi %c8_i32_99, %c5_i32 : i32
    %293 = arith.index_cast %292 : i32 to index
    %c0_100 = arith.constant 0 : index
    %294 = vector.load %arg11[%293, %c0_100] : memref<16x32xf32, #tpu.memory_space<vmem>>, vector<1x32xf32>
    tpu.vector_store %arg11[%293, %c0_100], %291 {strides = array<i32>} : memref<16x32xf32, #tpu.memory_space<vmem>>, vector<1x32xf32>,
    %c6_i32 = arith.constant 6 : i32
    %c0_i32_101 = arith.constant 0 : i32
    %295 = arith.addi %c0_i32_101, %c6_i32 : i32
    %296 = arith.index_cast %295 : i32 to index
    %c0_102 = arith.constant 0 : index
    %297 = vector.load %arg13[%296, %c0_102] : memref<16x96xf32, #tpu.memory_space<vmem>>, vector<1x96xf32>
    %c8_i32_103 = arith.constant 8 : i32
    %298 = arith.addi %c8_i32_103, %c6_i32 : i32
    %299 = arith.index_cast %298 : i32 to index
    %c0_104 = arith.constant 0 : index
    %300 = vector.load %arg13[%299, %c0_104] : memref<16x96xf32, #tpu.memory_space<vmem>>, vector<1x96xf32>
    %301 = tpu.concatenate %297, %300 in 0 : vector<1x96xf32>, vector<1x96xf32> -> vector<2x96xf32>
    %cst_105 = arith.constant dense<0.000000e+00> : vector<2x96xf32>
    %302 = tpu.matmul %286, %28, %cst_105 {dimension_numbers = #tpu.dot_dimension_numbers<[1], [0], [0], [1], [0, 0, 1, 1], [], []>} : vector<2x32xf32>, vector<32x96xf32>, vector<2x96xf32> -> vector<2x96xf32>
    %303 = vector.broadcast %29 : vector<1x96xf32> to vector<2x96xf32>
    %304 = arith.addf %302, %303 : vector<2x96xf32>
    %305 = vector.extract_strided_slice %301 {offsets = [0, 0], sizes = [2, 32], strides = [1, 1]} : vector<2x96xf32> to vector<2x32xf32>
    %306 = vector.extract_strided_slice %304 {offsets = [0, 0], sizes = [2, 32], strides = [1, 1]} : vector<2x96xf32> to vector<2x32xf32>
    %307 = arith.addf %305, %306 : vector<2x32xf32>
    %308 = arith.negf %307 : vector<2x32xf32>
    %309 = math.exp %308 : vector<2x32xf32>
    %cst_106 = arith.constant 1.000000e+00 : f32
    %310 = vector.broadcast %cst_106 : f32 to vector<2x32xf32>
    %311 = arith.addf %310, %309 : vector<2x32xf32>
    %312 = arith.divf %310, %311 : vector<2x32xf32>
    %313 = vector.extract_strided_slice %301 {offsets = [0, 32], sizes = [2, 32], strides = [1, 1]} : vector<2x96xf32> to vector<2x32xf32>
    %314 = vector.extract_strided_slice %304 {offsets = [0, 32], sizes = [2, 32], strides = [1, 1]} : vector<2x96xf32> to vector<2x32xf32>
    %315 = arith.addf %313, %314 : vector<2x32xf32>
    %316 = arith.negf %315 : vector<2x32xf32>
    %317 = math.exp %316 : vector<2x32xf32>
    %cst_107 = arith.constant 1.000000e+00 : f32
    %318 = vector.broadcast %cst_107 : f32 to vector<2x32xf32>
    %319 = arith.addf %318, %317 : vector<2x32xf32>
    %320 = arith.divf %318, %319 : vector<2x32xf32>
    %321 = vector.extract_strided_slice %301 {offsets = [0, 64], sizes = [2, 32], strides = [1, 1]} : vector<2x96xf32> to vector<2x32xf32>
    %322 = vector.extract_strided_slice %304 {offsets = [0, 64], sizes = [2, 32], strides = [1, 1]} : vector<2x96xf32> to vector<2x32xf32>
    %323 = arith.mulf %312, %322 : vector<2x32xf32>
    %324 = arith.addf %321, %323 : vector<2x32xf32>
    %325 = math.tanh %324 : vector<2x32xf32>
    %cst_108 = arith.constant 1.000000e+00 : f32
    %326 = vector.broadcast %cst_108 : f32 to vector<2x32xf32>
    %327 = arith.subf %326, %320 : vector<2x32xf32>
    %328 = arith.mulf %327, %325 : vector<2x32xf32>
    %329 = arith.mulf %320, %286 : vector<2x32xf32>
    %330 = arith.addf %328, %329 : vector<2x32xf32>
    %331 = vector.extract_strided_slice %330 {offsets = [0, 0], sizes = [1, 32], strides = [1, 1]} : vector<2x32xf32> to vector<1x32xf32>
    %c0_i32_109 = arith.constant 0 : i32
    %332 = arith.addi %c0_i32_109, %c6_i32 : i32
    %333 = arith.index_cast %332 : i32 to index
    %c0_110 = arith.constant 0 : index
    %334 = vector.load %arg11[%333, %c0_110] : memref<16x32xf32, #tpu.memory_space<vmem>>, vector<1x32xf32>
    tpu.vector_store %arg11[%333, %c0_110], %331 {strides = array<i32>} : memref<16x32xf32, #tpu.memory_space<vmem>>, vector<1x32xf32>,
    %335 = vector.extract_strided_slice %330 {offsets = [1, 0], sizes = [1, 32], strides = [1, 1]} : vector<2x32xf32> to vector<1x32xf32>
    %c8_i32_111 = arith.constant 8 : i32
    %336 = arith.addi %c8_i32_111, %c6_i32 : i32
    %337 = arith.index_cast %336 : i32 to index
    %c0_112 = arith.constant 0 : index
    %338 = vector.load %arg11[%337, %c0_112] : memref<16x32xf32, #tpu.memory_space<vmem>>, vector<1x32xf32>
    tpu.vector_store %arg11[%337, %c0_112], %335 {strides = array<i32>} : memref<16x32xf32, #tpu.memory_space<vmem>>, vector<1x32xf32>,
    %c7_i32 = arith.constant 7 : i32
    %c0_i32_113 = arith.constant 0 : i32
    %339 = arith.addi %c0_i32_113, %c7_i32 : i32
    %340 = arith.index_cast %339 : i32 to index
    %c0_114 = arith.constant 0 : index
    %341 = vector.load %arg13[%340, %c0_114] : memref<16x96xf32, #tpu.memory_space<vmem>>, vector<1x96xf32>
    %c8_i32_115 = arith.constant 8 : i32
    %342 = arith.addi %c8_i32_115, %c7_i32 : i32
    %343 = arith.index_cast %342 : i32 to index
    %c0_116 = arith.constant 0 : index
    %344 = vector.load %arg13[%343, %c0_116] : memref<16x96xf32, #tpu.memory_space<vmem>>, vector<1x96xf32>
    %345 = tpu.concatenate %341, %344 in 0 : vector<1x96xf32>, vector<1x96xf32> -> vector<2x96xf32>
    %cst_117 = arith.constant dense<0.000000e+00> : vector<2x96xf32>
    %346 = tpu.matmul %330, %28, %cst_117 {dimension_numbers = #tpu.dot_dimension_numbers<[1], [0], [0], [1], [0, 0, 1, 1], [], []>} : vector<2x32xf32>, vector<32x96xf32>, vector<2x96xf32> -> vector<2x96xf32>
    %347 = vector.broadcast %29 : vector<1x96xf32> to vector<2x96xf32>
    %348 = arith.addf %346, %347 : vector<2x96xf32>
    %349 = vector.extract_strided_slice %345 {offsets = [0, 0], sizes = [2, 32], strides = [1, 1]} : vector<2x96xf32> to vector<2x32xf32>
    %350 = vector.extract_strided_slice %348 {offsets = [0, 0], sizes = [2, 32], strides = [1, 1]} : vector<2x96xf32> to vector<2x32xf32>
    %351 = arith.addf %349, %350 : vector<2x32xf32>
    %352 = arith.negf %351 : vector<2x32xf32>
    %353 = math.exp %352 : vector<2x32xf32>
    %cst_118 = arith.constant 1.000000e+00 : f32
    %354 = vector.broadcast %cst_118 : f32 to vector<2x32xf32>
    %355 = arith.addf %354, %353 : vector<2x32xf32>
    %356 = arith.divf %354, %355 : vector<2x32xf32>
    %357 = vector.extract_strided_slice %345 {offsets = [0, 32], sizes = [2, 32], strides = [1, 1]} : vector<2x96xf32> to vector<2x32xf32>
    %358 = vector.extract_strided_slice %348 {offsets = [0, 32], sizes = [2, 32], strides = [1, 1]} : vector<2x96xf32> to vector<2x32xf32>
    %359 = arith.addf %357, %358 : vector<2x32xf32>
    %360 = arith.negf %359 : vector<2x32xf32>
    %361 = math.exp %360 : vector<2x32xf32>
    %cst_119 = arith.constant 1.000000e+00 : f32
    %362 = vector.broadcast %cst_119 : f32 to vector<2x32xf32>
    %363 = arith.addf %362, %361 : vector<2x32xf32>
    %364 = arith.divf %362, %363 : vector<2x32xf32>
    %365 = vector.extract_strided_slice %345 {offsets = [0, 64], sizes = [2, 32], strides = [1, 1]} : vector<2x96xf32> to vector<2x32xf32>
    %366 = vector.extract_strided_slice %348 {offsets = [0, 64], sizes = [2, 32], strides = [1, 1]} : vector<2x96xf32> to vector<2x32xf32>
    %367 = arith.mulf %356, %366 : vector<2x32xf32>
    %368 = arith.addf %365, %367 : vector<2x32xf32>
    %369 = math.tanh %368 : vector<2x32xf32>
    %cst_120 = arith.constant 1.000000e+00 : f32
    %370 = vector.broadcast %cst_120 : f32 to vector<2x32xf32>
    %371 = arith.subf %370, %364 : vector<2x32xf32>
    %372 = arith.mulf %371, %369 : vector<2x32xf32>
    %373 = arith.mulf %364, %330 : vector<2x32xf32>
    %374 = arith.addf %372, %373 : vector<2x32xf32>
    %375 = vector.extract_strided_slice %374 {offsets = [0, 0], sizes = [1, 32], strides = [1, 1]} : vector<2x32xf32> to vector<1x32xf32>
    %c0_i32_121 = arith.constant 0 : i32
    %376 = arith.addi %c0_i32_121, %c7_i32 : i32
    %377 = arith.index_cast %376 : i32 to index
    %c0_122 = arith.constant 0 : index
    %378 = vector.load %arg11[%377, %c0_122] : memref<16x32xf32, #tpu.memory_space<vmem>>, vector<1x32xf32>
    tpu.vector_store %arg11[%377, %c0_122], %375 {strides = array<i32>} : memref<16x32xf32, #tpu.memory_space<vmem>>, vector<1x32xf32>,
    %379 = vector.extract_strided_slice %374 {offsets = [1, 0], sizes = [1, 32], strides = [1, 1]} : vector<2x32xf32> to vector<1x32xf32>
    %c8_i32_123 = arith.constant 8 : i32
    %380 = arith.addi %c8_i32_123, %c7_i32 : i32
    %381 = arith.index_cast %380 : i32 to index
    %c0_124 = arith.constant 0 : index
    %382 = vector.load %arg11[%381, %c0_124] : memref<16x32xf32, #tpu.memory_space<vmem>>, vector<1x32xf32>
    tpu.vector_store %arg11[%381, %c0_124], %379 {strides = array<i32>} : memref<16x32xf32, #tpu.memory_space<vmem>>, vector<1x32xf32>,
    %c8_i32_125 = arith.constant 8 : i32
    %c0_126 = arith.constant 0 : index
    %c0_127 = arith.constant 0 : index
    %383 = vector.load %arg12[%c0_126, %c0_127] : memref<2x32xf32, #tpu.memory_space<vmem>>, vector<2x32xf32>
    tpu.vector_store %arg12[%c0_126, %c0_127], %374 {strides = array<i32>} : memref<2x32xf32, #tpu.memory_space<vmem>>, vector<2x32xf32>,
    return
  }
}

</mosaic_0001>

<bundles_post_ra>
// kernel: encoder_forward.1
= control target key start
LH: loop header
LB: loop body
LE: loop exit
PB: predicated region body
PF: predicated region fallthrough
CT: control target
= control target key end

     0   :  { %18 = vsyncpa [#allocation4], 0  ;;  %vm55_vm0 = vcmask 261120   ;;  %s2113_s0 = inlined_call_operand.vmem [shape: f32[16,32], index: 0, kind: input, shape index: {}]   ;;  %s2114_s1 = inlined_call_operand.vmem [shape: f32[32,64], index: 1, kind: input, shape index: {}]   ;;  %s2115_s2 = inlined_call_operand.vmem [shape: f32[1,64], index: 2, kind: input, shape index: {}]   ;;  %s2116_s3 = inlined_call_operand.vmem [shape: f32[64,32], index: 3, kind: input, shape index: {}]   ;;  %s2117_s4 = inlined_call_operand.vmem [shape: f32[1,32], index: 4, kind: input, shape index: {}]   ;;  %s2118_s5 = inlined_call_operand.vmem [shape: f32[32,32], index: 5, kind: input, shape index: {}]   ;;  %s2119_s6 = inlined_call_operand.vmem [shape: f32[1,32], index: 6, kind: input, shape index: {}]   ;;  %s2120_s7 = inlined_call_operand.vmem [shape: f32[32,96], index: 7, kind: input, shape index: {}]   ;;  %s2121_s8 = inlined_call_operand.vmem [shape: f32[1,96], index: 8, kind: input, shape index: {}]   ;;  %s2122_s9 = inlined_call_operand.vmem [shape: f32[32,96], index: 9, kind: input, shape index: {}]   ;;  %s2123_s10 = inlined_call_operand.vmem [shape: f32[1,96], index: 10, kind: input, shape index: {}]   ;;  %s2124_s11 = inlined_call_operand.hbm [shape: f32[16,32], index: 11, kind: output, shape index: {0}]   ;;  %s2125_s12 = inlined_call_operand.hbm [shape: f32[2,32], index: 12, kind: output, shape index: {1}]  }
   0x1   :  { %v44_v0 = vld [vmem:[%s2114_s1] sm:$0xff]  ;;  %v45_v1 = vld [vmem:[%s2114_s1 + $0x8] sm:$0xff]  ;;  %v46_v2 = vld [vmem:[%s2114_s1 + $0x10] sm:$0xff] }
   0x2   :  { %v1590_v3 = vpack.c.bf16 %v45_v1, %v44_v0  ;;  %v47_v4 = vld [vmem:[%s2114_s1 + $0x18] sm:$0xff]  ;;  %v42_v5 = vld [vmem:[%s2113_s0] sm:$0xff]  ;;  %v140_v8 = vld [vmem:[%s2116_s3 + $0x8] sm:$0xff] }
   0x3   :  { %v1594_v6 = vpack.c.bf16 %v47_v4, %v46_v2  ;;  %1458 = vmatprep.mubr.msk.f32.mxu0 %vm55_vm0, %v42_v5  ;;  %v139_v7 = vld [vmem:[%s2116_s3] sm:$0xff]  ;;  %v141_v9 = vld [vmem:[%s2116_s3 + $0x10] sm:$0xff]  ;;  %v142_v11 = vld [vmem:[%s2116_s3 + $0x18] sm:$0xff] }
   0x4   :  { %1591 = vmatprep.subr.bf16.mxu0 %v1590_v3  ;;  %v1598_v10 = vpack.c.bf16 %v140_v8, %v139_v7  ;;  %v1602_v12 = vpack.c.bf16 %v142_v11, %v141_v9  ;;  %v143_v13 = vld [vmem:[%s2116_s3 + $0x20] sm:$0xff]  ;;  %v144_v14 = vld [vmem:[%s2116_s3 + $0x28] sm:$0xff] }
   0x5   :  { %1593 = vmatpush3.bf16.msra.mxu0 %v1590_v3 }
   0x6   :  { %19 = vsyncpa [#allocation6], 0  ;;  %1595 = vmatprep.subr.bf16.mxu0 %v1594_v6  ;;  %1599 = vmatprep.subr.bf16.mxu1 %v1598_v10  ;;  %v1606_v15 = vpack.c.bf16 %v144_v14, %v143_v13  ;;  %v43_v16 = vld [vmem:[%s2113_s0 + $0x8] sm:$0xff]  ;;  %v145_v17 = vld [vmem:[%s2116_s3 + $0x30] sm:$0xff]  ;;  %vm154_vm1 = vcmask 523264   ;;  %v1783_v36 = vmov 0.0|0.0  }
   0x7   :  { %1601 = vmatpush3.bf16.msra.mxu1 %v1598_v10  ;;  %v146_v18 = vld [vmem:[%s2116_s3 + $0x38] sm:$0xff]  ;;  %v238_v20 = vld [vmem:[%s2118_s5] sm:$0xff]  ;;  %v239_v21 = vld [vmem:[%s2118_s5 + $0x8] sm:$0xff]  ;;  %vm1784_vm2 = vmmov 0   ;;  %v1785_v39 = vmov 0.0   ;;  %s1786_s16 = smov 64  }
   0x8   :  { %1603 = vmatprep.subr.bf16.mxu1 %v1602_v12  ;;  %v1610_v19 = vpack.c.bf16 %v146_v18, %v145_v17  ;;  %v1614_v22 = vpack.c.bf16 %v239_v21, %v238_v20  ;;  %v1354_v23 = vld [vmem:[%s2115_s2] ss:$0 sm:$0xff]  ;;  %v240_v30 = vld [vmem:[%s2118_s5 + $0x10] sm:$0xff]  ;;  %v241_v31 = vld [vmem:[%s2118_s5 + $0x18] sm:$0xff]  ;;  %vm424_vm3 = vcmask 785408   ;;  %vm437_vm4 = vcmask 1040384  }
   0x9   :  { %1597 = vmatpush3.bf16.msra.mxu0 %v1594_v6  ;;  %v1618_v32 = vpack.c.bf16 %v241_v31, %v240_v30  ;;  %v427_v33 = vld [vmem:[%s2122_s9] sm:$0xff]  ;;  %v428_v34 = vld [vmem:[%s2122_s9 + $0x8] sm:$0xff]  ;;  %v429_v35 = vld [vmem:[%s2122_s9 + $0x10] sm:$0xff]  ;;  %vm548_vm5 = vcmask 253952   ;;  %vm550_vm6 = vcmask 254977   ;;  %s1789_s1 = smov [#allocation5]  }
   0xa   :  { %1615 = vmatprep.subr.bf16.mxu0 %v1614_v22  ;;  %v1926_v37 = vpack.c.bf16 %v428_v34, %v427_v33  ;;  %v430_v38 = vld [vmem:[%s2122_s9 + $0x18] sm:$0xff]  ;;  %v332_v40 = vld [vmem:[%s2120_s7] sm:$0xff]  ;;  %v333_v41 = vld [vmem:[%s2120_s7 + $0x8] sm:$0xff]  ;;  %s1342_s2 = sshll.u32 %s1789_s1, 4  ;;  %vm1322_vm7 = vcmask 254976   ;;  %s2080_s2 = int_to_ptr.vmem [resolvable:$true] %s1342_s2 }
   0xb   :  { %1605 = vmatpush3.bf16.msra.mxu1 %v1602_v12  ;;  %v1622_v42 = vpack.c.bf16 %v333_v41, %v332_v40  ;;  %v1940_v43 = vpack.c.bf16 %v430_v38, %v429_v35  ;;  %v1357_v44 = vld [vmem:[%s2117_s4] ss:$0 sm:$0xff]  ;;  %v334_v51 = vld [vmem:[%s2120_s7 + $0x10] sm:$0xff]  ;;  %v335_v52 = vld [vmem:[%s2120_s7 + $0x18] sm:$0xff] }
   0xc   :  { %1459 = vmatmul.mubr.msk.f32.vlgmr.msra.gmra.mrb[0].mxu0 %vm55_vm0, %v43_v16  ;;  %1607 = vmatprep.subr.bf16.mxu1 %v1606_v15  ;;  %v1626_v53 = vpack.c.bf16 %v335_v52, %v334_v51  ;;  %v1967_v54 = vld [vmem:[%s2123_s10] ss:$0 sm:$0xff]  ;;  %s1788_s10 = smov [#allocation3]  }
   0xd   :  { %1617 = vmatpush3.bf16.msra.mxu0 %v1614_v22  ;;  %v1360_v58 = vld [vmem:[%s2119_s6] ss:$0 sm:$0xff]  ;;  %s1329_s18 = sshll.u32 %s1788_s10, 4  ;;  %s1330_s18 = int_to_ptr.vmem [resolvable:$true] %s1329_s18 }
   0xe   :  { %1619 = vmatprep.subr.bf16.mxu0 %v1618_v32  ;;  %v1363_v1 = vld [vmem:[%s2121_s8] ss:$0 sm:$0xff]  ;;  %s1787_s8 = smov 96   ;;  %s1735_s19 = scalar_lea.vmem %s1330_s18, 256 }
   0xf   :  { %1609 = vmatpush3.bf16.msra.mxu1 %v1606_v15  ;;  %p1736_p0 = scmp.ne.s32.totalorder %s1330_s18, %s1735_s19  ;;  %p1740_p1 = scmp.lt.s32.totalorder %s1330_s18, %s1330_s18 }
  0x10   :  { %1611 = vmatprep.subr.bf16.mxu1 %v1610_v19  ;;  %p1741_p2 = scmp.lt.s32.totalorder %s1735_s19, %s1735_s19 }
  0x11   :  { %1621 = vmatpush3.bf16.msra.mxu0 %v1618_v32 }
  0x12   :  { %1623 = vmatprep.subr.bf16.mxu0 %v1622_v42  ;;  %p1742_p3 = por %p1741_p2, %p1740_p1 }
  0x13   :  { %1613 = vmatpush3.bf16.msra.mxu1 %v1610_v19 }
  0x14   :  { %1630 = vmatprep.subr.bf16.mxu1 %v1783_v36  ;;  %p1743_p4 = pnand %p1742_p3, %p1736_p0 }
  0xdf   :  { %v1460_v24 = vpop.f32.mrb[0].mxu0 }
  0xe0   :  { %v134_v25 = vadd.f32 %v1460_v24, %v1354_v23  ;;  %v128_v26 = vpop.f32.mrb[1].mxu0 }
  0xe1   :  { %v129_v27 = vadd.f32 %v1354_v23, %v128_v26 }
  0xe2   :  { %v138_v29 = vmax.f32 %v134_v25, 0.0 }
  0xe3   :  { %v137_v28 = vmax.f32 %v129_v27, 0.0 }
  0xe5   :  { %1477 = vmatprep.mubr.msk.f32.mxu1 %vm154_vm1, %v137_v28 }
  0xe6   :  { %1478 = vmatmul.mubr.msk.f32.vlgmr.msra.gmra.mrb[0].mxu1 %vm154_vm1, %v138_v29 }
  0xe7   :  { %1510 = vmatprep.mubr.msk.f32.mxu1 %vm1784_vm2, %v1785_v39  ;;  %1632 = vmatpush3.bf16.msra.mxu1 %v1926_v37 }
  0xe8   :  { %1633 = vmatprep.subr.bf16.mxu1 %v1783_v36 }
  0xeb   :  { %1635 = vmatpush3.bf16.msra.mxu1 %v1940_v43 }
  0xec   :  { %1642 = vmatprep.subr.bf16.mxu1 %v1783_v36 }
  0xee   :  { %1511 = vmatmul.mubr.f32.vlgmr.msra.gmra.mrb[2].mxu1 %v1785_v39 }
  0xef   :  { %1644 = vmatpush3.bf16.msra.mxu1 %v1926_v37  ;;  %1532 = vmatprep.mubr.msk.f32.mxu1 %vm1784_vm2, %v1785_v39 }
  0xf0   :  { %1645 = vmatprep.subr.bf16.mxu1 %v1783_v36 }
  0xf3   :  { %1647 = vmatpush3.bf16.msra.mxu1 %v1940_v43 }
  0xf4   :  { %1654 = vmatprep.subr.bf16.mxu1 %v1783_v36 }
 0x1b9   :  { %v1479_v45 = vpop.f32.mrb[0].mxu1 }
 0x1ba   :  { %v233_v46 = vadd.f32 %v1479_v45, %v1357_v44  ;;  %v227_v47 = vpop.f32.mrb[1].mxu1 }
 0x1bb   :  { %v228_v48 = vadd.f32 %v1357_v44, %v227_v47 }
 0x1bc   :  { %v237_v50 = vmax.f32 %v233_v46, 0.0 }
 0x1bd   :  { %v236_v49 = vmax.f32 %v228_v48, 0.0 }
 0x1bf   :  { %1488 = vmatprep.mubr.msk.f32.mxu0 %vm55_vm0, %v236_v49 }
 0x1c0   :  { %1489 = vmatmul.mubr.msk.f32.vlgmr.msra.gmra.mrb[2].mxu0 %vm55_vm0, %v237_v50 }
 0x1c1   :  { %1625 = vmatpush3.bf16.msra.mxu0 %v1622_v42  ;;  %v514_v55 = vpop.f32.mrb[2].mxu1 }
 0x1c2   :  { %1627 = vmatprep.subr.bf16.mxu0 %v1626_v53  ;;  %v515_v56 = vadd.f32 %v1967_v54, %v514_v55  ;;  %v1512_v57 = vpop.f32.mrb[3].mxu1 }
 0x1c4   :  { %526 = vrot.lane.b32.xlu0 %v515_v56, %s1786_s16 }
 0x1c5   :  { %1629 = vmatpush3.bf16.msra.mxu0 %v1626_v53 }
 0x1c6   :  { %1636 = vmatprep.subr.bf16.mxu0 %v1783_v36 }
 0x236   :  { %v527_v14 = vpop.permute.xlu0 %526 }
 0x293   :  { %v1490_v59 = vpop.f32.mrb[2].mxu0 }
 0x294   :  { %v327_v60 = vadd.f32 %v1490_v59, %v1360_v58  ;;  %v321_v61 = vpop.f32.mrb[3].mxu0 }
 0x295   :  { %v322_v62 = vadd.f32 %v1360_v58, %v321_v61 }
 0x296   :  { %v331_v0 = vmax.f32 %v327_v60, 0.0 }
 0x297   :  { %v330_v63 = vmax.f32 %v322_v62, 0.0 }
 0x299   :  { %1499 = vmatprep.mubr.msk.f32.mxu0 %vm55_vm0, %v330_v63 }
 0x29a   :  { %1500 = vmatmul.mubr.msk.f32.vlgmr.msra.gmra.mrb[4].mxu0 %vm55_vm0, %v331_v0 }
 0x29b   :  { %1638 = vmatpush3.bf16.msra.mxu0 %v1926_v37  ;;  %1521 = vmatprep.mubr.msk.f32.mxu0 %vm1784_vm2, %v1785_v39 }
 0x29c   :  { %1639 = vmatprep.subr.bf16.mxu0 %v1783_v36 }
 0x29f   :  { %1641 = vmatpush3.bf16.msra.mxu0 %v1940_v43 }
 0x2a0   :  { %1648 = vmatprep.subr.bf16.mxu0 %v1783_v36 }
 0x36d   :  { %v1501_v2 = vpop.f32.mrb[4].mxu0 }
 0x36e   :  { %v421_v3 = vadd.f32 %v1501_v2, %v1363_v1  ;;  %v415_v4 = vpop.f32.mrb[5].mxu0 }
 0x36f   :  { %v416_v5 = vadd.f32 %v1363_v1, %v415_v4 }
 0x370   :  { %426 = vst.msk [vmem:[#allocation2 + $0x8] sm:$0xff] %vm424_vm3, %v421_v3 }
 0x371   :  { %425 = vst.msk [vmem:[#allocation2] sm:$0xff] %vm424_vm3, %v416_v5 }
 0x377   :  { %v433_v6 = vld [vmem:[#allocation2 + $0x8] sm:$0x1]  ;;  %v553_v29 = vld [vmem:[#allocation2 + $0x9] sm:$0x1]  ;;  %v663_v57 = vld [vmem:[#allocation2 + $0xa] sm:$0x1] }
 0x378   :  { %v435_v7 = vrot.slane %v433_v6, 7  ;;  %v432_v8 = vld [vmem:[#allocation2] sm:$0x1]  ;;  %v555_v30 = vrot.slane %v553_v29, 7  ;;  %v552_v31 = vld [vmem:[#allocation2 + $0x1] sm:$0x1] }
 0x379   :  { %v665_v58 = vrot.slane %v663_v57, 7  ;;  %v662_v59 = vld [vmem:[#allocation2 + $0x2] sm:$0x1] }
 0x37a   :  { %v438_v9 = vsel %vm437_vm4, %v432_v8, %v435_v7  ;;  %v557_v32 = vsel %vm437_vm4, %v552_v31, %v555_v30 }
 0x37b   :  { %v518_v10 = vadd.f32 %v515_v56, %v438_v9  ;;  %v667_v60 = vsel %vm437_vm4, %v662_v59, %v665_v58 }
 0x37d   :  { %v1367_v11 = vmul.f32 -1.442695, %v518_v10 }
 0x37f   :  { %1687 = vpow2.f32 %v1367_v11 }
 0x389   :  { %v1688_v12 = vpop.eup %1687 }
 0x38a   :  { %v522_v13 = vadd.f32 1.0, %v1688_v12 }
 0x38c   :  { %1689 = vrcp.f32 %v522_v13 }
 0x396   :  { %v1690_v15 = vpop.eup %1689 }
 0x397   :  { %v529_v16 = vmul.f32 %v1690_v15, %v527_v14  ;;  %v536_v20 = vsub.f32 1.0, %v1690_v15  ;;  %v542_v22 = vmul.f32 0.0, %v1690_v15 }
 0x399   :  { %531 = vrot.lane.b32.xlu0 %v529_v16, %s1786_s16  ;;  %v773_v16 = vld [vmem:[#allocation2 + $0xb] sm:$0x1] }
 0x40b   :  { %v532_v17 = vpop.permute.xlu0 %531 }
 0x40c   :  { %v534_v18 = vadd.f32 %v532_v17, %v438_v9  ;;  %v775_v17 = vrot.slane %v773_v16, 7 }
 0x40e   :  { %1691 = vtanh.f32 %v534_v18  ;;  %v772_v18 = vld [vmem:[#allocation2 + $0x3] sm:$0x1] }
 0x418   :  { %v1692_v19 = vpop.eup %1691 }
 0x419   :  { %538 = vrot.lane.b32.xlu1 %v1692_v19, %s1787_s8  ;;  %v777_v19 = vsel %vm437_vm4, %v772_v18, %v775_v17 }
 0x48b   :  { %v539_v21 = vpop.permute.xlu1 %538 }
 0x48c   :  { %v541_v23 = vmul.f32 %v539_v21, %v536_v20 }
 0x48e   :  { %v543_v24 = vadd.f32 %v542_v22, %v541_v23 }
 0x490   :  { %545 = vrot.lane.b32.xlu1 %v543_v24, %s1787_s8 }
 0x502   :  { %v546_v25 = vpop.permute.xlu1 %545 }
 0x503   :  { %549 = vst.msk [vmem:[#allocation3] sm:$0x1] %vm548_vm5, %v546_v25  ;;  %1522 = vmatmul.mubr.msk.f32.vlgmr.msra.gmra.mrb[6].mxu0 %vm55_vm0, %v546_v25 }
 0x504   :  { %551 = vst.msk [vmem:[#allocation3 + $0x7] sm:$0x2] %vm550_vm6, %v546_v25  ;;  %1650 = vmatpush3.bf16.msra.mxu0 %v1926_v37  ;;  %1543 = vmatprep.mubr.msk.f32.mxu0 %vm1784_vm2, %v1785_v39 }
 0x505   :  { %1651 = vmatprep.subr.bf16.mxu0 %v1783_v36 }
 0x508   :  { %1653 = vmatpush3.bf16.msra.mxu0 %v1940_v43 }
 0x509   :  { %1660 = vmatprep.subr.bf16.mxu0 %v1783_v36 }
 0x5d6   :  { %v626_v26 = vpop.f32.mrb[6].mxu0 }
 0x5d7   :  { %v627_v27 = vadd.f32 %v1967_v54, %v626_v26  ;;  %v1523_v28 = vpop.f32.mrb[7].mxu0 }
 0x5d9   :  { %638 = vrot.lane.b32.xlu0 %v627_v27, %s1786_s16  ;;  %v630_v33 = vadd.f32 %v627_v27, %v557_v32 }
 0x5db   :  { %v1369_v34 = vmul.f32 -1.442695, %v630_v33 }
 0x5dd   :  { %1693 = vpow2.f32 %v1369_v34 }
 0x5e7   :  { %v1694_v35 = vpop.eup %1693 }
 0x5e8   :  { %v634_v38 = vadd.f32 1.0, %v1694_v35 }
 0x5ea   :  { %1695 = vrcp.f32 %v634_v38 }
 0x5f4   :  { %v1696_v40 = vpop.eup %1695 }
 0x5f5   :  { %v648_v47 = vsub.f32 1.0, %v1696_v40  ;;  %v654_v49 = vmul.f32 %v1696_v40, %v543_v24 }
 0x64b   :  { %v639_v41 = vpop.permute.xlu0 %638 }
 0x64c   :  { %v641_v42 = vmul.f32 %v1696_v40, %v639_v41 }
 0x64e   :  { %643 = vrot.lane.b32.xlu1 %v641_v42, %s1786_s16  ;;  %v883_v42 = vld [vmem:[#allocation2 + $0xc] sm:$0x1] }
 0x6c0   :  { %v644_v44 = vpop.permute.xlu1 %643 }
 0x6c1   :  { %v646_v45 = vadd.f32 %v644_v44, %v557_v32  ;;  %v885_v44 = vrot.slane %v883_v42, 7 }
 0x6c3   :  { %1697 = vtanh.f32 %v646_v45  ;;  %v882_v45 = vld [vmem:[#allocation2 + $0x4] sm:$0x1] }
 0x6cd   :  { %v1698_v46 = vpop.eup %1697 }
 0x6ce   :  { %650 = vrot.lane.b32.xlu0 %v1698_v46, %s1787_s8  ;;  %v887_v46 = vsel %vm437_vm4, %v882_v45, %v885_v44 }
 0x740   :  { %v651_v48 = vpop.permute.xlu0 %650 }
 0x741   :  { %v653_v50 = vmul.f32 %v651_v48, %v648_v47 }
 0x743   :  { %v655_v51 = vadd.f32 %v654_v49, %v653_v50 }
 0x745   :  { %657 = vrot.lane.b32.xlu1 %v655_v51, %s1787_s8 }
 0x7b7   :  { %v658_v52 = vpop.permute.xlu1 %657 }
 0x7b8   :  { %660 = vst.msk [vmem:[#allocation3 + $0x1] sm:$0x1] %vm548_vm5, %v658_v52  ;;  %1533 = vmatmul.mubr.msk.f32.vlgmr.msra.gmra.mrb[4].mxu1 %vm55_vm0, %v658_v52 }
 0x7b9   :  { %661 = vst.msk [vmem:[#allocation3 + $0x8] sm:$0x2] %vm550_vm6, %v658_v52  ;;  %1656 = vmatpush3.bf16.msra.mxu1 %v1926_v37  ;;  %1554 = vmatprep.mubr.msk.f32.mxu1 %vm1784_vm2, %v1785_v39 }
 0x7ba   :  { %1657 = vmatprep.subr.bf16.mxu1 %v1783_v36 }
 0x7bd   :  { %1659 = vmatpush3.bf16.msra.mxu1 %v1940_v43 }
 0x7be   :  { %1666 = vmatprep.subr.bf16.mxu1 %v1783_v36 }
 0x88b   :  { %v736_v53 = vpop.f32.mrb[4].mxu1 }
 0x88c   :  { %v737_v55 = vadd.f32 %v1967_v54, %v736_v53  ;;  %v1534_v56 = vpop.f32.mrb[5].mxu1 }
 0x88e   :  { %748 = vrot.lane.b32.xlu0 %v737_v55, %s1786_s16  ;;  %v740_v61 = vadd.f32 %v737_v55, %v667_v60 }
 0x890   :  { %v1371_v62 = vmul.f32 -1.442695, %v740_v61 }
 0x892   :  { %1699 = vpow2.f32 %v1371_v62 }
 0x89c   :  { %v1700_v63 = vpop.eup %1699 }
 0x89d   :  { %v744_v0 = vadd.f32 1.0, %v1700_v63 }
 0x89f   :  { %1701 = vrcp.f32 %v744_v0 }
 0x8a9   :  { %v1702_v1 = vpop.eup %1701 }
 0x8aa   :  { %v758_v7 = vsub.f32 1.0, %v1702_v1  ;;  %v764_v9 = vmul.f32 %v1702_v1, %v655_v51 }
 0x900   :  { %v749_v2 = vpop.permute.xlu0 %748 }
 0x901   :  { %v751_v3 = vmul.f32 %v1702_v1, %v749_v2 }
 0x903   :  { %753 = vrot.lane.b32.xlu1 %v751_v3, %s1786_s16  ;;  %v993_v3 = vld [vmem:[#allocation2 + $0xd] sm:$0x1] }
 0x975   :  { %v754_v4 = vpop.permute.xlu1 %753 }
 0x976   :  { %v756_v5 = vadd.f32 %v754_v4, %v667_v60  ;;  %v995_v4 = vrot.slane %v993_v3, 7 }
 0x978   :  { %1703 = vtanh.f32 %v756_v5  ;;  %v992_v5 = vld [vmem:[#allocation2 + $0x5] sm:$0x1] }
 0x982   :  { %v1704_v6 = vpop.eup %1703 }
 0x983   :  { %760 = vrot.lane.b32.xlu0 %v1704_v6, %s1787_s8  ;;  %v997_v6 = vsel %vm437_vm4, %v992_v5, %v995_v4 }
 0x9f5   :  { %v761_v8 = vpop.permute.xlu0 %760 }
 0x9f6   :  { %v763_v10 = vmul.f32 %v761_v8, %v758_v7 }
 0x9f8   :  { %v765_v11 = vadd.f32 %v764_v9, %v763_v10 }
 0x9fa   :  { %767 = vrot.lane.b32.xlu1 %v765_v11, %s1787_s8 }
 0xa6c   :  { %v768_v12 = vpop.permute.xlu1 %767 }
 0xa6d   :  { %770 = vst.msk [vmem:[#allocation3 + $0x2] sm:$0x1] %vm548_vm5, %v768_v12  ;;  %1544 = vmatmul.mubr.msk.f32.vlgmr.msra.gmra.mrb[8].mxu0 %vm55_vm0, %v768_v12 }
 0xa6e   :  { %771 = vst.msk [vmem:[#allocation3 + $0x9] sm:$0x2] %vm550_vm6, %v768_v12  ;;  %1662 = vmatpush3.bf16.msra.mxu0 %v1926_v37  ;;  %1565 = vmatprep.mubr.msk.f32.mxu0 %vm1784_vm2, %v1785_v39 }
 0xa6f   :  { %1663 = vmatprep.subr.bf16.mxu0 %v1783_v36 }
 0xa72   :  { %1665 = vmatpush3.bf16.msra.mxu0 %v1940_v43 }
 0xa73   :  { %1672 = vmatprep.subr.bf16.mxu0 %v1783_v36 }
 0xb40   :  { %v846_v13 = vpop.f32.mrb[8].mxu0 }
 0xb41   :  { %v847_v14 = vadd.f32 %v1967_v54, %v846_v13  ;;  %v1545_v15 = vpop.f32.mrb[9].mxu0 }
 0xb43   :  { %858 = vrot.lane.b32.xlu0 %v847_v14, %s1786_s16  ;;  %v850_v20 = vadd.f32 %v847_v14, %v777_v19 }
 0xb45   :  { %v1373_v21 = vmul.f32 -1.442695, %v850_v20 }
 0xb47   :  { %1705 = vpow2.f32 %v1373_v21 }
 0xb51   :  { %v1706_v22 = vpop.eup %1705 }
 0xb52   :  { %v854_v23 = vadd.f32 1.0, %v1706_v22  ;;  %v1103_v22 = vld [vmem:[#allocation2 + $0xe] sm:$0x1] }
 0xb54   :  { %1707 = vrcp.f32 %v854_v23  ;;  %v1105_v23 = vrot.slane %v1103_v22, 7 }
 0xb5e   :  { %v1708_v24 = vpop.eup %1707 }
 0xb5f   :  { %v868_v30 = vsub.f32 1.0, %v1708_v24  ;;  %v874_v32 = vmul.f32 %v1708_v24, %v765_v11 }
 0xbb5   :  { %v859_v25 = vpop.permute.xlu0 %858 }
 0xbb6   :  { %v861_v26 = vmul.f32 %v1708_v24, %v859_v25  ;;  %v1102_v24 = vld [vmem:[#allocation2 + $0x6] sm:$0x1] }
 0xbb7   :  { %v1107_v25 = vsel %vm437_vm4, %v1102_v24, %v1105_v23 }
 0xbb8   :  { %863 = vrot.lane.b32.xlu1 %v861_v26, %s1786_s16 }
 0xc2a   :  { %v864_v27 = vpop.permute.xlu1 %863 }
 0xc2b   :  { %v866_v28 = vadd.f32 %v864_v27, %v777_v19 }
 0xc2d   :  { %1709 = vtanh.f32 %v866_v28 }
 0xc37   :  { %v1710_v29 = vpop.eup %1709 }
 0xc38   :  { %870 = vrot.lane.b32.xlu0 %v1710_v29, %s1787_s8 }
 0xcaa   :  { %v871_v31 = vpop.permute.xlu0 %870 }
 0xcab   :  { %v873_v33 = vmul.f32 %v871_v31, %v868_v30 }
 0xcad   :  { %v875_v34 = vadd.f32 %v874_v32, %v873_v33 }
 0xcaf   :  { %877 = vrot.lane.b32.xlu1 %v875_v34, %s1787_s8 }
 0xd21   :  { %v878_v35 = vpop.permute.xlu1 %877 }
 0xd22   :  { %880 = vst.msk [vmem:[#allocation3 + $0x3] sm:$0x1] %vm548_vm5, %v878_v35  ;;  %1555 = vmatmul.mubr.msk.f32.vlgmr.msra.gmra.mrb[6].mxu1 %vm55_vm0, %v878_v35 }
 0xd23   :  { %881 = vst.msk [vmem:[#allocation3 + $0xa] sm:$0x2] %vm550_vm6, %v878_v35  ;;  %1668 = vmatpush3.bf16.msra.mxu1 %v1926_v37  ;;  %1576 = vmatprep.mubr.msk.f32.mxu1 %vm1784_vm2, %v1785_v39 }
 0xd24   :  { %1669 = vmatprep.subr.bf16.mxu1 %v1783_v36 }
 0xd27   :  { %1671 = vmatpush3.bf16.msra.mxu1 %v1940_v43 }
 0xdf5   :  { %v956_v38 = vpop.f32.mrb[6].mxu1 }
 0xdf6   :  { %v957_v40 = vadd.f32 %v1967_v54, %v956_v38  ;;  %v1556_v41 = vpop.f32.mrb[7].mxu1 }
 0xdf8   :  { %968 = vrot.lane.b32.xlu0 %v957_v40, %s1786_s16  ;;  %v960_v47 = vadd.f32 %v957_v40, %v887_v46 }
 0xdfa   :  { %v1375_v48 = vmul.f32 -1.442695, %v960_v47 }
 0xdfc   :  { %1711 = vpow2.f32 %v1375_v48 }
 0xe06   :  { %v1712_v49 = vpop.eup %1711 }
 0xe07   :  { %v964_v50 = vadd.f32 1.0, %v1712_v49  ;;  %v1213_v49 = vld [vmem:[#allocation2 + $0xf] sm:$0x1] }
 0xe09   :  { %1713 = vrcp.f32 %v964_v50  ;;  %v1215_v50 = vrot.slane %v1213_v49, 7 }
 0xe13   :  { %v1714_v51 = vpop.eup %1713 }
 0xe14   :  { %v978_v58 = vsub.f32 1.0, %v1714_v51  ;;  %v984_v60 = vmul.f32 %v1714_v51, %v875_v34 }
 0xe6a   :  { %v969_v52 = vpop.permute.xlu0 %968 }
 0xe6b   :  { %v971_v53 = vmul.f32 %v1714_v51, %v969_v52  ;;  %v1212_v51 = vld [vmem:[#allocation2 + $0x7] sm:$0x1] }
 0xe6c   :  { %v1217_v52 = vsel %vm437_vm4, %v1212_v51, %v1215_v50 }
 0xe6d   :  { %973 = vrot.lane.b32.xlu1 %v971_v53, %s1786_s16 }
 0xedf   :  { %v974_v55 = vpop.permute.xlu1 %973 }
 0xee0   :  { %v976_v56 = vadd.f32 %v974_v55, %v887_v46 }
 0xee2   :  { %1715 = vtanh.f32 %v976_v56 }
 0xeec   :  { %v1716_v57 = vpop.eup %1715 }
 0xeed   :  { %980 = vrot.lane.b32.xlu0 %v1716_v57, %s1787_s8 }
 0xf5f   :  { %v981_v59 = vpop.permute.xlu0 %980 }
 0xf60   :  { %v983_v61 = vmul.f32 %v981_v59, %v978_v58 }
 0xf62   :  { %v985_v62 = vadd.f32 %v984_v60, %v983_v61 }
 0xf64   :  { %987 = vrot.lane.b32.xlu1 %v985_v62, %s1787_s8 }
 0xfd6   :  { %v988_v63 = vpop.permute.xlu1 %987 }
 0xfd7   :  { %990 = vst.msk [vmem:[#allocation3 + $0x4] sm:$0x1] %vm548_vm5, %v988_v63  ;;  %1566 = vmatmul.mubr.msk.f32.vlgmr.msra.gmra.mrb[10].mxu0 %vm55_vm0, %v988_v63 }
 0xfd8   :  { %991 = vst.msk [vmem:[#allocation3 + $0xb] sm:$0x2] %vm550_vm6, %v988_v63  ;;  %1674 = vmatpush3.bf16.msra.mxu0 %v1926_v37  ;;  %1587 = vmatprep.mubr.msk.f32.mxu0 %vm1784_vm2, %v1785_v39 }
 0xfd9   :  { %1675 = vmatprep.subr.bf16.mxu0 %v1783_v36 }
 0xfdc   :  { %1677 = vmatpush3.bf16.msra.mxu0 %v1940_v43 }
0x10aa   :  { %v1066_v0 = vpop.f32.mrb[10].mxu0 }
0x10ab   :  { %v1067_v1 = vadd.f32 %v1967_v54, %v1066_v0  ;;  %v1567_v2 = vpop.f32.mrb[11].mxu0 }
0x10ad   :  { %1078 = vrot.lane.b32.xlu0 %v1067_v1, %s1786_s16  ;;  %v1070_v7 = vadd.f32 %v1067_v1, %v997_v6 }
0x10af   :  { %v1377_v37 = vmul.f32 -1.442695, %v1070_v7 }
0x10b1   :  { %1717 = vpow2.f32 %v1377_v37 }
0x10bb   :  { %v1718_v8 = vpop.eup %1717 }
0x10bc   :  { %v1074_v39 = vadd.f32 1.0, %v1718_v8 }
0x10be   :  { %1719 = vrcp.f32 %v1074_v39 }
0x10c8   :  { %v1720_v36 = vpop.eup %1719 }
0x10c9   :  { %v1088_v13 = vsub.f32 1.0, %v1720_v36  ;;  %v1094_v15 = vmul.f32 %v1720_v36, %v985_v62 }
0x111f   :  { %v1079_v9 = vpop.permute.xlu0 %1078 }
0x1120   :  { %v1081_v43 = vmul.f32 %v1720_v36, %v1079_v9 }
0x1122   :  { %1083 = vrot.lane.b32.xlu1 %v1081_v43, %s1786_s16 }
0x1194   :  { %v1084_v10 = vpop.permute.xlu1 %1083 }
0x1195   :  { %v1086_v11 = vadd.f32 %v1084_v10, %v997_v6 }
0x1197   :  { %1721 = vtanh.f32 %v1086_v11 }
0x11a1   :  { %v1722_v12 = vpop.eup %1721 }
0x11a2   :  { %1090 = vrot.lane.b32.xlu0 %v1722_v12, %s1787_s8 }
0x1214   :  { %v1091_v14 = vpop.permute.xlu0 %1090 }
0x1215   :  { %v1093_v16 = vmul.f32 %v1091_v14, %v1088_v13 }
0x1217   :  { %v1095_v17 = vadd.f32 %v1094_v15, %v1093_v16 }
0x1219   :  { %1097 = vrot.lane.b32.xlu1 %v1095_v17, %s1787_s8 }
0x128b   :  { %v1098_v18 = vpop.permute.xlu1 %1097 }
0x128c   :  { %1100 = vst.msk [vmem:[#allocation3 + $0x5] sm:$0x1] %vm548_vm5, %v1098_v18  ;;  %1577 = vmatmul.mubr.msk.f32.vlgmr.msra.gmra.mrb[8].mxu1 %vm55_vm0, %v1098_v18 }
0x128d   :  { %1101 = vst.msk [vmem:[#allocation3 + $0xc] sm:$0x2] %vm550_vm6, %v1098_v18 }
0x135f   :  { %v1176_v19 = vpop.f32.mrb[8].mxu1 }
0x1360   :  { %v1177_v20 = vadd.f32 %v1967_v54, %v1176_v19  ;;  %v1578_v21 = vpop.f32.mrb[9].mxu1 }
0x1362   :  { %1188 = vrot.lane.b32.xlu0 %v1177_v20, %s1786_s16  ;;  %v1180_v26 = vadd.f32 %v1177_v20, %v1107_v25 }
0x1364   :  { %v1379_v27 = vmul.f32 -1.442695, %v1180_v26 }
0x1366   :  { %1723 = vpow2.f32 %v1379_v27 }
0x1370   :  { %v1724_v28 = vpop.eup %1723 }
0x1371   :  { %v1184_v29 = vadd.f32 1.0, %v1724_v28 }
0x1373   :  { %1725 = vrcp.f32 %v1184_v29 }
0x137d   :  { %v1726_v30 = vpop.eup %1725 }
0x137e   :  { %v1198_v38 = vsub.f32 1.0, %v1726_v30  ;;  %v1204_v41 = vmul.f32 %v1726_v30, %v1095_v17 }
0x13d4   :  { %v1189_v31 = vpop.permute.xlu0 %1188 }
0x13d5   :  { %v1191_v32 = vmul.f32 %v1726_v30, %v1189_v31 }
0x13d7   :  { %1193 = vrot.lane.b32.xlu1 %v1191_v32, %s1786_s16 }
0x1449   :  { %v1194_v33 = vpop.permute.xlu1 %1193 }
0x144a   :  { %v1196_v34 = vadd.f32 %v1194_v33, %v1107_v25 }
0x144c   :  { %1727 = vtanh.f32 %v1196_v34 }
0x1456   :  { %v1728_v35 = vpop.eup %1727 }
0x1457   :  { %1200 = vrot.lane.b32.xlu0 %v1728_v35, %s1787_s8 }
0x14c9   :  { %v1201_v40 = vpop.permute.xlu0 %1200 }
0x14ca   :  { %v1203_v42 = vmul.f32 %v1201_v40, %v1198_v38 }
0x14cc   :  { %v1205_v44 = vadd.f32 %v1204_v41, %v1203_v42 }
0x14ce   :  { %1207 = vrot.lane.b32.xlu1 %v1205_v44, %s1787_s8 }
0x1540   :  { %v1208_v45 = vpop.permute.xlu1 %1207 }
0x1541   :  { %1210 = vst.msk [vmem:[#allocation3 + $0x6] sm:$0x1] %vm548_vm5, %v1208_v45  ;;  %1588 = vmatmul.mubr.msk.f32.vlgmr.msra.gmra.mrb[12].mxu0 %vm55_vm0, %v1208_v45 }
0x1542   :  { %1211 = vst.msk [vmem:[#allocation3 + $0xd] sm:$0x2] %vm550_vm6, %v1208_v45 }
0x1614   :  { %v1286_v46 = vpop.f32.mrb[12].mxu0 }
0x1615   :  { %v1287_v47 = vadd.f32 %v1967_v54, %v1286_v46  ;;  %v1589_v48 = vpop.f32.mrb[13].mxu0 }
0x1617   :  { %1298 = vrot.lane.b32.xlu0 %v1287_v47, %s1786_s16  ;;  %v1290_v53 = vadd.f32 %v1287_v47, %v1217_v52 }
0x1619   :  { %v1381_v55 = vmul.f32 -1.442695, %v1290_v53 }
0x161b   :  { %1729 = vpow2.f32 %v1381_v55 }
0x1625   :  { %v1730_v56 = vpop.eup %1729 }
0x1626   :  { %v1294_v57 = vadd.f32 1.0, %v1730_v56 }
0x1628   :  { %1731 = vrcp.f32 %v1294_v57 }
0x1632   :  { %v1732_v58 = vpop.eup %1731 }
0x1633   :  { %v1308_v63 = vsub.f32 1.0, %v1732_v58  ;;  %v1314_v1 = vmul.f32 %v1732_v58, %v1205_v44 }
0x1689   :  { %v1299_v59 = vpop.permute.xlu0 %1298 }
0x168a   :  { %v1301_v60 = vmul.f32 %v1732_v58, %v1299_v59 }
0x168c   :  { %1303 = vrot.lane.b32.xlu1 %v1301_v60, %s1786_s16 }
0x16fe   :  { %v1304_v54 = vpop.permute.xlu1 %1303 }
0x16ff   :  { %v1306_v61 = vadd.f32 %v1304_v54, %v1217_v52 }
0x1701   :  { %1733 = vtanh.f32 %v1306_v61 }
0x170b   :  { %v1734_v62 = vpop.eup %1733 }
0x170c   :  { %1310 = vrot.lane.b32.xlu0 %v1734_v62, %s1787_s8 }
0x177e   :  { %v1311_v0 = vpop.permute.xlu0 %1310 }
0x177f   :  { %v1313_v2 = vmul.f32 %v1311_v0, %v1308_v63 }
0x1781   :  { %v1315_v3 = vadd.f32 %v1314_v1, %v1313_v2 }
0x1783   :  { %1317 = vrot.lane.b32.xlu1 %v1315_v3, %s1787_s8 }
0x17f5   :  { %v1318_v4 = vpop.permute.xlu1 %1317 }
0x17f6   :  { %1320 = vst.msk [vmem:[#allocation3 + $0x7] sm:$0x1] %vm548_vm5, %v1318_v4 }
0x17f7   :  { %1321 = vst.msk [vmem:[#allocation3 + $0xe] sm:$0x2] %vm550_vm6, %v1318_v4 }
0x17f8   :  { %1323 = vst.msk [vmem:[#allocation5] sm:$0x3] %vm1322_vm7, %v1318_v4 }
0x17f9   :  { %1746 = shalt.err (!%p1743_p4)
}
0x17fa   :  { %s1747_s22 = scalar_lea.hbm %s2124_s11, 256 }
0x17fb   :  { %p1748_p5 = scmp.ne.s32.totalorder %s2124_s11, %s1747_s22  ;;  %p1751_p6 = scmp.lt.u32.totalorder %s1747_s22, %s2124_s11 }
0x17fd   :  { %p1753_p7 = pnand %p1751_p6, %p1748_p5 }
0x17ff   :  { %1756 = shalt.err (!%p1753_p7)
}
0x1800   :  { %s1790_s26 = smov 128   ;;  %s1791_s27 = smov 8  }
0x1801   :  { %1335 = dma.vmem_to_hbm [thread:$0]  %s1330_s18, 256, %s2124_s11, [#allocation4], %s1790_s26, %s1790_s26, %s1791_s27  }
0x1802   :  { %s1757_s29 = scalar_lea.vmem %s2080_s2, 32  ;;  %p1762_p9 = scmp.lt.s32.totalorder %s2080_s2, %s2080_s2 }
0x1803   :  { %p1758_p8 = scmp.ne.s32.totalorder %s2080_s2, %s1757_s29  ;;  %p1763_p10 = scmp.lt.s32.totalorder %s1757_s29, %s1757_s29 }
0x1805   :  { %p1764_p11 = por %p1763_p10, %p1762_p9 }
0x1807   :  { %p1765_p12 = pnand %p1764_p11, %p1758_p8 }
0x1809   :  { %1768 = shalt.err (!%p1765_p12)
}
0x180a   :  { %s1769_s0 = scalar_lea.hbm %s2125_s12, 32 }
0x180b   :  { %p1770_p13 = scmp.ne.s32.totalorder %s2125_s12, %s1769_s0  ;;  %p1773_p0 = scmp.lt.u32.totalorder %s1769_s0, %s2125_s12 }
0x180d   :  { %p1775_p1 = pnand %p1773_p0, %p1770_p13 }
0x180f   :  { %1778 = shalt.err (!%p1775_p1)
}
0x1810   :  { %1345 = dma.vmem_to_hbm [thread:$0]  %s2080_s2, 32, %s2125_s12, [#allocation6]  }
0x1811   :  { %1779 = dma.done.wait [#allocation4], 256  }
0x1812   :  { %1780 = vsyncadd [#allocation4], 4294967040 }
0x1813   :  { %1781 = dma.done.wait [#allocation6], 32  }
0x1814   :  { %1782 = vsyncadd [#allocation6], 4294967264 }
0x1815   :  { %1352 = vsyncpa [#allocation4], 1 }
0x1816   :  { %1353 = vsyncpa [#allocation6], 1 }

</bundles_post_ra>
